<compile_context>
chip_gen: v7x
topology: tpu7x:2x2x1
jax: 0.10.0
libtpu: 0.0.40
codegen_flags: <defaults>
</compile_context>

<pallas_src>
import jax
import jax.numpy as jnp
from jax.experimental import pallas as pl
from jax.experimental.pallas import tpu as pltpu


# ----------------------------------------------------------------------------
# Pallas kernel: per-tap accumulating matmul + bias (the conv hot path)
#   grid = (N // block_n, n_taps); reduction (taps) is the last, "arbitrary" axis
# ----------------------------------------------------------------------------
def _tap_matmul_bias_kernel(lhs_ref, w_ref, b_ref, o_ref, acc_ref):
    k = pl.program_id(1)

    @pl.when(k == 0)
    def _init():
        acc_ref[...] = jnp.zeros_like(acc_ref)

    # (M, K) bf16 @ (K, block_n) bf16 -> f32 accumulate on the MXU.
    acc_ref[...] += jnp.dot(lhs_ref[0], w_ref[0],
                            preferred_element_type=jnp.float32)

    @pl.when(k == pl.num_programs(1) - 1)
    def _finalize():
        o_ref[...] = (acc_ref[...] + b_ref[...]).astype(o_ref.dtype)


def tap_matmul_bias(lhs_taps, w_taps, bias, *, block_n, out_dtype=jnp.float32):
    """lhs_taps: (T, M, K); w_taps: (T, K, N); bias: (N,) -> (M, N) out_dtype.

    Computes sum_t lhs_taps[t] @ w_taps[t] + bias with a tap-pipelined Pallas
    kernel (one tap per reduction step, output tiled lane-dense over N).
    """
    T, M, K = lhs_taps.shape
    Tw, Kw, N = w_taps.shape
    assert T == Tw and K == Kw
    assert M % 8 == 0 and K % 128 == 0 and N % block_n == 0 and block_n % 128 == 0

    return pl.pallas_call(
        _tap_matmul_bias_kernel,
        out_shape=jax.ShapeDtypeStruct((M, N), out_dtype),
        grid_spec=pltpu.PrefetchScalarGridSpec(
            num_scalar_prefetch=0,
            grid=(N // block_n, T),
            in_specs=[
                pl.BlockSpec((1, M, K), lambda i, k: (k, 0, 0)),
                pl.BlockSpec((1, K, block_n), lambda i, k: (k, 0, i)),
                pl.BlockSpec((1, block_n), lambda i, k: (0, i)),
            ],
            out_specs=pl.BlockSpec((M, block_n), lambda i, k: (0, i)),
            scratch_shapes=[pltpu.VMEM((M, block_n), jnp.float32)],
        ),
        compiler_params=pltpu.CompilerParams(
            dimension_semantics=("parallel", "arbitrary"),
            vmem_limit_bytes=32 * 1024 * 1024,
        ),
    )(
        lhs_taps.astype(jnp.bfloat16),      # bf16 halves HBM traffic
        w_taps.astype(jnp.bfloat16),
        bias.reshape(1, -1).astype(jnp.float32),
    )


# ----------------------------------------------------------------------------
# im2col organized per tap: (k*k, N*Ho*Wo, Cin) — feeds the tap-matmul kernel.
# ----------------------------------------------------------------------------
def im2col_taps(x_nhwc, ksize, stride, pad):
    Nb, H, W, Cin = x_nhwc.shape
    Ho = (H + 2 * pad - ksize) // stride + 1
    Wo = (W + 2 * pad - ksize) // stride + 1
    xp = jnp.pad(x_nhwc, ((0, 0), (pad, pad), (pad, pad), (0, 0)))
    taps = []
    for dy in range(ksize):
        for dx in range(ksize):
            patch = xp[:, dy:dy + stride * Ho:stride, dx:dx + stride * Wo:stride, :]
            taps.append(patch.reshape(Nb * Ho * Wo, Cin))
    return jnp.stack(taps, axis=0), Ho, Wo


# ----------------------------------------------------------------------------
# Fused RPN head weights: conv2_1 (1x1,36ch) embedded as center tap of a 3x3,
# concatenated with conv2_2 (3x3,18ch), Cout zero-padded to 128 (lane-dense).
# ----------------------------------------------------------------------------
def build_fused_head_weights(w2_1, b2_1, w2_2, b2_2, n_pad=128):
    c1 = w2_1.shape[0]          # 36
    c2 = w2_2.shape[0]          # 18
    cin = w2_1.shape[1]         # 512
    w = jnp.zeros((3, 3, cin, n_pad), jnp.float32)
    # 1x1 conv == center tap of a 3x3 conv with pad=1, stride=1.
    w = w.at[1, 1, :, :c1].set(jnp.transpose(w2_1[:, :, 0, 0], (1, 0)))
    w = w.at[:, :, :, c1:c1 + c2].set(jnp.transpose(w2_2, (2, 3, 1, 0)))
    b = jnp.zeros((n_pad,), jnp.float32)
    b = b.at[:c1].set(b2_1).at[c1:c1 + c2].set(b2_2)
    return w.reshape(9, cin, n_pad), b, c1, c2


# ----------------------------------------------------------------------------
# Simplified RPN proposal (F.proposal is NOT a standard torch op)
# TODO(synk): F.proposal's exact semantics (NMS, min-size filtering, pre/post
# top-N, channel ordering) have no public reference; here we do anchor decode
# + top-k in plain JAX.  Layout assumptions: bbox deltas = (A,4) contiguous,
# scores = (2,A) with index 1 = foreground.
# ----------------------------------------------------------------------------
def _generate_anchors(ho, wo, stride, scales=(2.0, 4.0, 8.0), ratios=(0.5, 1.0, 2.0)):
    ws, hs = [], []
    for r in ratios:
        for s in scales:
            ws.append(stride * s * (1.0 / r) ** 0.5)
            hs.append(stride * s * r ** 0.5)
    ws = jnp.asarray(ws, jnp.float32)
    hs = jnp.asarray(hs, jnp.float32)
    yy, xx = jnp.meshgrid(
        jnp.arange(ho, dtype=jnp.float32) * stride + stride / 2.0,
        jnp.arange(wo, dtype=jnp.float32) * stride + stride / 2.0,
        indexing="ij",
    )
    cx = xx[..., None]
    cy = yy[..., None]
    return jnp.stack(
        [cx - ws / 2.0, cy - hs / 2.0, cx + ws / 2.0, cy + hs / 2.0], axis=-1
    )  # (ho, wo, A, 4)


def simple_proposal(bbox_deltas, scores, im_size, feat_stride, top_n=16):
    """bbox_deltas: (N,Ho,Wo,36); scores: (N,Ho,Wo,18) -> rois (N*K,5), rois_num (N,)."""
    Nb, Ho, Wo, _ = bbox_deltas.shape
    A = 9
    anchors = _generate_anchors(Ho, Wo, stride=feat_stride)
    aw = anchors[..., 2] - anchors[..., 0]
    ah = anchors[..., 3] - anchors[..., 1]
    acx = anchors[..., 0] + 0.5 * aw
    acy = anchors[..., 1] + 0.5 * ah

    rois_list, nums = [], []
    for n in range(Nb):
        d = bbox_deltas[n].reshape(Ho, Wo, A, 4)
        s = scores[n].reshape(Ho, Wo, 2, A)            # (bg, fg) per anchor (assumed)
        fg = jax.nn.softmax(s, axis=2)[:, :, 1, :]     # (Ho, Wo, A)

        cx = acx + d[..., 0] * aw
        cy = acy + d[..., 1] * ah
        bw = aw * jnp.exp(d[..., 2])
        bh = ah * jnp.exp(d[..., 3])
        x1 = jnp.clip(cx - 0.5 * bw, 0.0, im_size[1] - 1.0)
        y1 = jnp.clip(cy - 0.5 * bh, 0.0, im_size[0] - 1.0)
        x2 = jnp.clip(cx + 0.5 * bw, 0.0, im_size[1] - 1.0)
        y2 = jnp.clip(cy + 0.5 * bh, 0.0, im_size[0] - 1.0)
        boxes = jnp.stack([x1, y1, x2, y2], axis=-1).reshape(-1, 4)

        k = min(top_n, boxes.shape[0])
        _, idx = jax.lax.top_k(fg.reshape(-1), k)
        sel = boxes[idx]
        rois_list.append(
            jnp.concatenate([jnp.full((k, 1), float(n), jnp.float32), sel], axis=1)
        )
        nums.append(k)

    rois = jnp.concatenate(rois_list, axis=0)
    actual_rois_num = jnp.asarray(nums, dtype=jnp.int32)
    return rois, actual_rois_num


# ----------------------------------------------------------------------------
# toy_fasterrcnn forward
# ----------------------------------------------------------------------------
def init_params(key):
    k = jax.random.split(key, 6)
    return {
        "w1":   jax.random.normal(k[0], (512, 512, 3, 3), jnp.float32) * 0.01,
        "b1":   jax.random.normal(k[1], (512,), jnp.float32) * 0.01,
        "w2_1": jax.random.normal(k[2], (36, 512, 1, 1), jnp.float32) * 0.01,
        "b2_1": jax.random.normal(k[3], (36,), jnp.float32) * 0.01,
        "w2_2": jax.random.normal(k[4], (18, 512, 3, 3), jnp.float32) * 0.01,
        "b2_2": jax.random.normal(k[5], (18,), jnp.float32) * 0.01,
    }


def toy_fasterrcnn_forward(x_nchw, params):
    Nb, Cin, H, W = x_nchw.shape
    # NCHW -> NHWC, bf16 before im2col (halves im2col HBM write + kernel DMA).
    x = jnp.transpose(x_nchw, (0, 2, 3, 1)).astype(jnp.bfloat16)

    # conv1: 3x3, stride 2, pad 1, 512 -> 512 (tap-pipelined, bf16 in / bf16 out).
    lhs1, Ho, Wo = im2col_taps(x, ksize=3, stride=2, pad=1)
    w1_taps = jnp.transpose(params["w1"], (2, 3, 1, 0)).reshape(9, Cin, 512)
    h = tap_matmul_bias(lhs1, w1_taps, params["b1"],
                        block_n=256, out_dtype=jnp.bfloat16)
    h = h.reshape(Nb, Ho, Wo, 512)

    # fused RPN head: conv2_1 (1x1 -> 36) + conv2_2 (3x3 p1 -> 18) as ONE
    # lane-dense (N=128) matmul sharing a single im2col of h.
    w_head, b_head, c1, c2 = build_fused_head_weights(
        params["w2_1"], params["b2_1"], params["w2_2"], params["b2_2"])
    lhs2, Ho2, Wo2 = im2col_taps(h, ksize=3, stride=1, pad=1)
    head = tap_matmul_bias(lhs2, w_head, b_head,
                           block_n=128, out_dtype=jnp.float32)  # (M, 128)
    x1 = head[:, :c1].reshape(Nb, Ho2, Wo2, c1)                 # bbox deltas (36)
    x2 = head[:, c1:c1 + c2].reshape(Nb, Ho2, Wo2, c2)          # cls scores (18)

    im_size = (H, W)
    rois, actual_rois_num = simple_proposal(x1, x2, im_size, feat_stride=2)
    return rois, actual_rois_num


if __name__ == "__main__":
    key = jax.random.PRNGKey(0)
    pkey, xkey = jax.random.split(key)
    params = init_params(pkey)

    # Channels must be 512 for this module; use 1x512x16x16 (NCHW).
    x = jax.random.normal(xkey, (1, 512, 16, 16), jnp.float32)

    fwd = jax.jit(toy_fasterrcnn_forward)
    rois, actual_rois_num = fwd(x, params)
    jax.block_until_ready((rois, actual_rois_num))

    assert rois.shape == (16, 5) and rois.dtype == jnp.float32
    assert actual_rois_num.shape == (1,) and actual_rois_num.dtype == jnp.int32
    print("KERNEL_OK")
</pallas_src>

<mosaic_0001>
module attributes {stable_mosaic.version = 11 : i64} {
  func.func @_tap_matmul_bias_kernel(%arg0: i32, %arg1: i32, %arg2: memref<1x64x512xbf16, #tpu.memory_space<vmem>>, %arg3: memref<1x512x256xbf16, #tpu.memory_space<vmem>>, %arg4: memref<1x256xf32, #tpu.memory_space<vmem>>, %arg5: memref<64x256xbf16, #tpu.memory_space<vmem>>, %arg6: memref<64x256xf32, #tpu.memory_space<vmem>>) attributes {dimension_semantics = [#tpu.dimension_semantics<parallel>, #tpu.dimension_semantics<arbitrary>], iteration_bounds = array<i64: 2, 9>, scalar_prefetch = 0 : i64, scratch_operands = 1 : i64, tpu.core_type = #tpu.core_type<tc>, window_params = [{transform_indices = @transform_0, window_bounds = array<i64: 1, 64, 512>}, {transform_indices = @transform_1, window_bounds = array<i64: 1, 512, 256>}, {transform_indices = @transform_2, window_bounds = array<i64: 1, 256>}, {transform_indices = @transform_3, window_bounds = array<i64: 64, 256>}]} {
    %c0_i32 = arith.constant 0 : i32
    %0 = arith.cmpi eq, %arg1, %c0_i32 : i32
    %1 = arith.extui %0 : i1 to i32
    %c0_i32_0 = arith.constant 0 : i32
    %2 = arith.cmpi ne, %1, %c0_i32_0 : i32
    scf.if %2 {
      %cst_11 = arith.constant 0.000000e+00 : f32
      %14 = vector.broadcast %cst_11 : f32 to vector<64x256xf32>
      %c0_12 = arith.constant 0 : index
      %c0_13 = arith.constant 0 : index
      %15 = vector.load %arg6[%c0_12, %c0_13] : memref<64x256xf32, #tpu.memory_space<vmem>>, vector<64x256xf32>
      tpu.vector_store %arg6[%c0_12, %c0_13], %14 {strides = array<i32>} : memref<64x256xf32, #tpu.memory_space<vmem>>, vector<64x256xf32>,
    } else {
    }
    %c0 = arith.constant 0 : index
    %c0_1 = arith.constant 0 : index
    %3 = vector.load %arg6[%c0, %c0_1] : memref<64x256xf32, #tpu.memory_space<vmem>>, vector<64x256xf32>
    %c0_2 = arith.constant 0 : index
    %c0_3 = arith.constant 0 : index
    %c0_4 = arith.constant 0 : index
    %4 = vector.load %arg2[%c0_2, %c0_3, %c0_4] : memref<1x64x512xbf16, #tpu.memory_space<vmem>>, vector<1x64x512xbf16>
    %5 = vector.shape_cast %4 : vector<1x64x512xbf16> to vector<64x512xbf16>
    %c0_5 = arith.constant 0 : index
    %c0_6 = arith.constant 0 : index
    %c0_7 = arith.constant 0 : index
    %6 = vector.load %arg3[%c0_5, %c0_6, %c0_7] : memref<1x512x256xbf16, #tpu.memory_space<vmem>>, vector<1x512x256xbf16>
    %7 = vector.shape_cast %6 : vector<1x512x256xbf16> to vector<512x256xbf16>
    %cst = arith.constant dense<0.000000e+00> : vector<64x256xf32>
    %8 = tpu.matmul %5, %7, %cst {dimension_numbers = #tpu.dot_dimension_numbers<[1], [0], [0], [1], [0, 0, 1, 1], [], []>} : vector<64x512xbf16>, vector<512x256xbf16>, vector<64x256xf32> -> vector<64x256xf32>
    %9 = arith.addf %3, %8 : vector<64x256xf32>
    %c0_8 = arith.constant 0 : index
    %c0_9 = arith.constant 0 : index
    %10 = vector.load %arg6[%c0_8, %c0_9] : memref<64x256xf32, #tpu.memory_space<vmem>>, vector<64x256xf32>
    tpu.vector_store %arg6[%c0_8, %c0_9], %9 {strides = array<i32>} : memref<64x256xf32, #tpu.memory_space<vmem>>, vector<64x256xf32>,
    %c8_i32 = arith.constant 8 : i32
    %11 = arith.cmpi eq, %arg1, %c8_i32 : i32
    %12 = arith.extui %11 : i1 to i32
    %c0_i32_10 = arith.constant 0 : i32
    %13 = arith.cmpi ne, %12, %c0_i32_10 : i32
    scf.if %13 {
      %c0_11 = arith.constant 0 : index
      %c0_12 = arith.constant 0 : index
      %14 = vector.load %arg6[%c0_11, %c0_12] : memref<64x256xf32, #tpu.memory_space<vmem>>, vector<64x256xf32>
      %c0_13 = arith.constant 0 : index
      %c0_14 = arith.constant 0 : index
      %15 = vector.load %arg4[%c0_13, %c0_14] : memref<1x256xf32, #tpu.memory_space<vmem>>, vector<1x256xf32>
      %16 = vector.broadcast %15 : vector<1x256xf32> to vector<64x256xf32>
      %17 = arith.addf %14, %16 : vector<64x256xf32>
      %18 = arith.truncf %17 : vector<64x256xf32> to vector<64x256xbf16>
      %c0_15 = arith.constant 0 : index
      %c0_16 = arith.constant 0 : index
      %19 = vector.load %arg5[%c0_15, %c0_16] : memref<64x256xbf16, #tpu.memory_space<vmem>>, vector<64x256xbf16>
      tpu.vector_store %arg5[%c0_15, %c0_16], %18 {strides = array<i32>} : memref<64x256xbf16, #tpu.memory_space<vmem>>, vector<64x256xbf16>,
    } else {
    }
    return
  }
  func.func @transform_0(%arg0: i32, %arg1: i32) -> (i32, i32, i32) {
    %c0_i32 = arith.constant 0 : i32
    %c0_i32_0 = arith.constant 0 : i32
    %c0_i32_1 = arith.constant 0 : i32
    return %arg1, %c0_i32, %c0_i32_0 : i32, i32, i32
  }
  func.func @transform_1(%arg0: i32, %arg1: i32) -> (i32, i32, i32) {
    %c0_i32 = arith.constant 0 : i32
    %c0_i32_0 = arith.constant 0 : i32
    return %arg1, %c0_i32, %arg0 : i32, i32, i32
  }
  func.func @transform_2(%arg0: i32, %arg1: i32) -> (i32, i32) {
    %c0_i32 = arith.constant 0 : i32
    %c0_i32_0 = arith.constant 0 : i32
    return %c0_i32, %arg0 : i32, i32
  }
  func.func @transform_3(%arg0: i32, %arg1: i32) -> (i32, i32) {
    %c0_i32 = arith.constant 0 : i32
    %c0_i32_0 = arith.constant 0 : i32
    return %c0_i32, %arg0 : i32, i32
  }
}

module attributes {stable_mosaic.version = 11 : i64} {
  func.func @_tap_matmul_bias_kernel(%arg0: i32, %arg1: i32, %arg2: memref<1x64x512xbf16, #tpu.memory_space<vmem>>, %arg3: memref<1x512x128xbf16, #tpu.memory_space<vmem>>, %arg4: memref<1x128xf32, #tpu.memory_space<vmem>>, %arg5: memref<64x128xf32, #tpu.memory_space<vmem>>, %arg6: memref<64x128xf32, #tpu.memory_space<vmem>>) attributes {dimension_semantics = [#tpu.dimension_semantics<parallel>, #tpu.dimension_semantics<arbitrary>], iteration_bounds = array<i64: 1, 9>, scalar_prefetch = 0 : i64, scratch_operands = 1 : i64, tpu.core_type = #tpu.core_type<tc>, window_params = [{transform_indices = @transform_0, window_bounds = array<i64: 1, 64, 512>}, {transform_indices = @transform_1, window_bounds = array<i64: 1, 512, 128>}, {transform_indices = @transform_2, window_bounds = array<i64: 1, 128>}, {transform_indices = @transform_3, window_bounds = array<i64: 64, 128>}]} {
    %c0_i32 = arith.constant 0 : i32
    %0 = arith.cmpi eq, %arg1, %c0_i32 : i32
    %1 = arith.extui %0 : i1 to i32
    %c0_i32_0 = arith.constant 0 : i32
    %2 = arith.cmpi ne, %1, %c0_i32_0 : i32
    scf.if %2 {
      %cst_11 = arith.constant 0.000000e+00 : f32
      %14 = vector.broadcast %cst_11 : f32 to vector<64x128xf32>
      %c0_12 = arith.constant 0 : index
      %c0_13 = arith.constant 0 : index
      %15 = vector.load %arg6[%c0_12, %c0_13] : memref<64x128xf32, #tpu.memory_space<vmem>>, vector<64x128xf32>
      tpu.vector_store %arg6[%c0_12, %c0_13], %14 {strides = array<i32>} : memref<64x128xf32, #tpu.memory_space<vmem>>, vector<64x128xf32>,
    } else {
    }
    %c0 = arith.constant 0 : index
    %c0_1 = arith.constant 0 : index
    %3 = vector.load %arg6[%c0, %c0_1] : memref<64x128xf32, #tpu.memory_space<vmem>>, vector<64x128xf32>
    %c0_2 = arith.constant 0 : index
    %c0_3 = arith.constant 0 : index
    %c0_4 = arith.constant 0 : index
    %4 = vector.load %arg2[%c0_2, %c0_3, %c0_4] : memref<1x64x512xbf16, #tpu.memory_space<vmem>>, vector<1x64x512xbf16>
    %5 = vector.shape_cast %4 : vector<1x64x512xbf16> to vector<64x512xbf16>
    %c0_5 = arith.constant 0 : index
    %c0_6 = arith.constant 0 : index
    %c0_7 = arith.constant 0 : index
    %6 = vector.load %arg3[%c0_5, %c0_6, %c0_7] : memref<1x512x128xbf16, #tpu.memory_space<vmem>>, vector<1x512x128xbf16>
    %7 = vector.shape_cast %6 : vector<1x512x128xbf16> to vector<512x128xbf16>
    %cst = arith.constant dense<0.000000e+00> : vector<64x128xf32>
    %8 = tpu.matmul %5, %7, %cst {dimension_numbers = #tpu.dot_dimension_numbers<[1], [0], [0], [1], [0, 0, 1, 1], [], []>} : vector<64x512xbf16>, vector<512x128xbf16>, vector<64x128xf32> -> vector<64x128xf32>
    %9 = arith.addf %3, %8 : vector<64x128xf32>
    %c0_8 = arith.constant 0 : index
    %c0_9 = arith.constant 0 : index
    %10 = vector.load %arg6[%c0_8, %c0_9] : memref<64x128xf32, #tpu.memory_space<vmem>>, vector<64x128xf32>
    tpu.vector_store %arg6[%c0_8, %c0_9], %9 {strides = array<i32>} : memref<64x128xf32, #tpu.memory_space<vmem>>, vector<64x128xf32>,
    %c8_i32 = arith.constant 8 : i32
    %11 = arith.cmpi eq, %arg1, %c8_i32 : i32
    %12 = arith.extui %11 : i1 to i32
    %c0_i32_10 = arith.constant 0 : i32
    %13 = arith.cmpi ne, %12, %c0_i32_10 : i32
    scf.if %13 {
      %c0_11 = arith.constant 0 : index
      %c0_12 = arith.constant 0 : index
      %14 = vector.load %arg6[%c0_11, %c0_12] : memref<64x128xf32, #tpu.memory_space<vmem>>, vector<64x128xf32>
      %c0_13 = arith.constant 0 : index
      %c0_14 = arith.constant 0 : index
      %15 = vector.load %arg4[%c0_13, %c0_14] : memref<1x128xf32, #tpu.memory_space<vmem>>, vector<1x128xf32>
      %16 = vector.broadcast %15 : vector<1x128xf32> to vector<64x128xf32>
      %17 = arith.addf %14, %16 : vector<64x128xf32>
      %c0_15 = arith.constant 0 : index
      %c0_16 = arith.constant 0 : index
      %18 = vector.load %arg5[%c0_15, %c0_16] : memref<64x128xf32, #tpu.memory_space<vmem>>, vector<64x128xf32>
      tpu.vector_store %arg5[%c0_15, %c0_16], %17 {strides = array<i32>} : memref<64x128xf32, #tpu.memory_space<vmem>>, vector<64x128xf32>,
    } else {
    }
    return
  }
  func.func @transform_0(%arg0: i32, %arg1: i32) -> (i32, i32, i32) {
    %c0_i32 = arith.constant 0 : i32
    %c0_i32_0 = arith.constant 0 : i32
    %c0_i32_1 = arith.constant 0 : i32
    return %arg1, %c0_i32, %c0_i32_0 : i32, i32, i32
  }
  func.func @transform_1(%arg0: i32, %arg1: i32) -> (i32, i32, i32) {
    %c0_i32 = arith.constant 0 : i32
    %c0_i32_0 = arith.constant 0 : i32
    return %arg1, %c0_i32, %arg0 : i32, i32, i32
  }
  func.func @transform_2(%arg0: i32, %arg1: i32) -> (i32, i32) {
    %c0_i32 = arith.constant 0 : i32
    %c0_i32_0 = arith.constant 0 : i32
    return %c0_i32, %arg0 : i32, i32
  }
  func.func @transform_3(%arg0: i32, %arg1: i32) -> (i32, i32) {
    %c0_i32 = arith.constant 0 : i32
    %c0_i32_0 = arith.constant 0 : i32
    return %c0_i32, %arg0 : i32, i32
  }
}

</mosaic_0001>

<bundles_post_ra>
// kernel: toy_fasterrcnn_forward.2
= control target key start
LH: loop header
LB: loop body
LE: loop exit
PB: predicated region body
PF: predicated region fallthrough
CT: control target
= control target key end

     0   :  { %s1890_s12 = smov 0   ;;  %s1892_s13 = smov 0   ;;  %s2267_s0 = inlined_call_operand.vmem [shape: bf16[9,64,512], index: 0, kind: input, shape index: {}]   ;;  %s2268_s1 = inlined_call_operand.vmem [shape: bf16[9,512,512], index: 1, kind: input, shape index: {}]   ;;  %s2269_s2 = inlined_call_operand.vmem [shape: f32[1,512], index: 2, kind: input, shape index: {}]   ;;  %s2270_s3 = inlined_call_operand.vmem [shape: bf16[64,512], index: 3, kind: output, shape index: {}]  }
   0x1   :  { %s1894_s14 = smov 0   ;;  %s1896_s15 = smov 0  }
   0x2   :  { %s1898_s16 = smov 0   ;;  %s1900_s17 = smov 0  }
   0x3   :  { %s1902_s18 = smov 0   ;;  %s1904_s19 = smov 0  }
   0x4   :  { %s1906_s20 = smov 0  }
   0x5 LB: > { %s22_s21 = sadd.s32 1, %s1859_s18  ;;  %s25_s22 = sadd.s32 1, %s1863_s19  ;;  %s1867_s20 = sphi %s1906_s20, %s13_s20   ;;  %s1863_s19 = sphi %s1904_s19, %s2280_s19   ;;  %s1859_s18 = sphi %s1902_s18, %s2279_s18   ;;  %s1855_s17 = sphi %s1900_s17, %s2278_s17   ;;  %s1851_s16 = sphi %s1898_s16, %s2277_s16   ;;  %s1847_s15 = sphi %s1896_s15, %s2276_s15   ;;  %s1843_s14 = sphi %s1894_s14, %s2275_s14   ;;  %s1839_s13 = sphi %s1892_s13, %s2274_s13   ;;  %s1835_s12 = sphi %s1890_s12, %s2273_s12  }
   0x6   : > { %p23_p0 = scmp.ge.s32.totalorder %s22_s21, 9  ;;  %p67_p1 = scmp.ne.s32.totalorder %s1847_s15, %s1843_s14 }
   0x7   : > { %s1469_s23 = sadd.s32 4294967295, %s1867_s20   ;;  %p68_p2 = scmp.eq.s32.totalorder %s1867_s20, 0 }
   0x8   : > { %s2282_s21 = smov (%p23_p0, %s22_s21), 0  ;;  %s2284_s22 = smov (!%p23_p0, %s25_s22), %s1863_s19 }
   0x9   : > { %p27_p3 = scmp.ge.s32.totalorder %s2284_s22, 2  ;;  %s55_s24 = ssub.s32 %s1859_s18, %s2282_s21 }
   0xa   : > { %p1946_p4 = por %p68_p2, %p67_p1  ;;  %p122_p5 = scmp.ne.s32.totalorder %s1839_s13, %s1835_s12 }
   0xb   : > { %s2286_s22 = smov (%p27_p3, %s2284_s22), 0  ;;  %s60_s26 = sadd.s32 1, %s1847_s15 }
   0xc   : > { %p123_p6 = scmp.eq.s32.totalorder %s1469_s23, 17  ;;  %s56_s27 = ssub.s32 %s1863_s19, %s2286_s22 }
   0xd   : > { %s112_s28 = sadd.s32 1, %s1839_s13  ;;  %s57_s29 = sor.u32 %s56_s27, %s55_s24 }
   0xe   : > { %p110_p7 = scmp.eq.s32.totalorder %s56_s27, 0  ;;  %p58_p8 = scmp.eq.s32.totalorder %s57_s29, 0 }
   0xf   : > { %p1958_p9 = por %p123_p6, %p122_p5  ;;  %p1472_p10 = scmp.ge.s32.totalorder %s1867_s20, 18 }
  0x10   : > { %s1963_s4 = scalar_select %p110_p7, %s1839_s13, %s112_s28  }
  0x11   : > { %s1966_s5 = scalar_select %p58_p8, %s1847_s15, %s60_s26  }
  0x12   : > { %145 = sbr.rel (%p1472_p10) target bundleno = 64 (0x40), region = 16 }
  0x19   : > { %156 = sbr.rel (!%p1946_p4) target bundleno = 64 (0x40), region = 24  ;;  %s158_s6 = sand.u32 (%p1946_p4), 1, %s1847_s15  }
  0x1a   : > { %s1474_s7 = sshll.u32 (%p1946_p4), %s1863_s19, 1  ;;  %s1473_s8 = sshll.u32 (%p1946_p4), %s158_s6, 9 }
  0x1b   : > { %s1475_s9 = sshll.u32 (%p1946_p4), %s1859_s18, 8  ;;  %s1982_s25 = scalar_lea.vmem (%p1946_p4), [#allocation3], %s1473_s8 }
  0x1c   : > { %s163_s10 = sadd.s32 (%p1946_p4), %s1475_s9, %s1474_s7 }
  0x1d   : > { %s1476_s11 = sshll.u32 (%p1946_p4), %s163_s10, 2 }
  0x1e   : > { %s1977_s26 = scalar_lea.vmem (%p1946_p4), %s2268_s1, %s1476_s11 }
  0x1f   : > { %v319_v0 = vld [vmem:[%s1977_s26] sm:$0xff] (%p1946_p4)  ;;  %v321_v1 = vld [vmem:[%s1977_s26 + $0x10] sm:$0xff] (%p1946_p4) }
  0x20   : > { %v323_v2 = vld [vmem:[%s1977_s26 + $0x20] sm:$0xff]  ;;  %320 = vst [vmem:[%s1982_s25] sm:$0xff] %v319_v0  ;;  %322 = vst [vmem:[%s1982_s25 + $0x8] sm:$0xff] %v321_v1  ;;  %v325_v3 = vld [vmem:[%s1977_s26 + $0x30] sm:$0xff] }
  0x21   : > { %324 = vst [vmem:[%s1982_s25 + $0x10] sm:$0xff] %v323_v2  ;;  %v327_v4 = vld [vmem:[%s1977_s26 + $0x40] sm:$0xff]  ;;  %v329_v5 = vld [vmem:[%s1977_s26 + $0x50] sm:$0xff]  ;;  %326 = vst [vmem:[%s1982_s25 + $0x18] sm:$0xff] %v325_v3 }
  0x22   : > { %328 = vst [vmem:[%s1982_s25 + $0x20] sm:$0xff] %v327_v4  ;;  %330 = vst [vmem:[%s1982_s25 + $0x28] sm:$0xff] %v329_v5  ;;  %v331_v6 = vld [vmem:[%s1977_s26 + $0x60] sm:$0xff]  ;;  %v333_v7 = vld [vmem:[%s1977_s26 + $0x70] sm:$0xff] }
  0x23   : > { %v335_v8 = vld [vmem:[%s1977_s26 + $0x80] sm:$0xff]  ;;  %332 = vst [vmem:[%s1982_s25 + $0x30] sm:$0xff] %v331_v6  ;;  %334 = vst [vmem:[%s1982_s25 + $0x38] sm:$0xff] %v333_v7  ;;  %v337_v9 = vld [vmem:[%s1977_s26 + $0x90] sm:$0xff] }
  0x24   : > { %336 = vst [vmem:[%s1982_s25 + $0x40] sm:$0xff] %v335_v8  ;;  %v339_v10 = vld [vmem:[%s1977_s26 + $0xa0] sm:$0xff]  ;;  %v341_v11 = vld [vmem:[%s1977_s26 + $0xb0] sm:$0xff]  ;;  %338 = vst [vmem:[%s1982_s25 + $0x48] sm:$0xff] %v337_v9 }
  0x25   : > { %340 = vst [vmem:[%s1982_s25 + $0x50] sm:$0xff] %v339_v10  ;;  %342 = vst [vmem:[%s1982_s25 + $0x58] sm:$0xff] %v341_v11  ;;  %v343_v12 = vld [vmem:[%s1977_s26 + $0xc0] sm:$0xff]  ;;  %v345_v13 = vld [vmem:[%s1977_s26 + $0xd0] sm:$0xff] }
  0x26   : > { %v347_v14 = vld [vmem:[%s1977_s26 + $0xe0] sm:$0xff]  ;;  %344 = vst [vmem:[%s1982_s25 + $0x60] sm:$0xff] %v343_v12  ;;  %346 = vst [vmem:[%s1982_s25 + $0x68] sm:$0xff] %v345_v13  ;;  %v349_v15 = vld [vmem:[%s1977_s26 + $0xf0] sm:$0xff] }
  0x27   : > { %348 = vst [vmem:[%s1982_s25 + $0x70] sm:$0xff] %v347_v14  ;;  %v351_v16 = vld [vmem:[%s1977_s26 + $0x100] sm:$0xff]  ;;  %v353_v17 = vld [vmem:[%s1977_s26 + $0x110] sm:$0xff]  ;;  %350 = vst [vmem:[%s1982_s25 + $0x78] sm:$0xff] %v349_v15 }
  0x28   : > { %352 = vst [vmem:[%s1982_s25 + $0x80] sm:$0xff] %v351_v16  ;;  %354 = vst [vmem:[%s1982_s25 + $0x88] sm:$0xff] %v353_v17  ;;  %v355_v18 = vld [vmem:[%s1977_s26 + $0x120] sm:$0xff]  ;;  %v357_v19 = vld [vmem:[%s1977_s26 + $0x130] sm:$0xff] }
  0x29   : > { %v359_v20 = vld [vmem:[%s1977_s26 + $0x140] sm:$0xff]  ;;  %356 = vst [vmem:[%s1982_s25 + $0x90] sm:$0xff] %v355_v18  ;;  %358 = vst [vmem:[%s1982_s25 + $0x98] sm:$0xff] %v357_v19  ;;  %v361_v21 = vld [vmem:[%s1977_s26 + $0x150] sm:$0xff] }
  0x2a   : > { %360 = vst [vmem:[%s1982_s25 + $0xa0] sm:$0xff] %v359_v20  ;;  %v363_v22 = vld [vmem:[%s1977_s26 + $0x160] sm:$0xff]  ;;  %v365_v23 = vld [vmem:[%s1977_s26 + $0x170] sm:$0xff]  ;;  %362 = vst [vmem:[%s1982_s25 + $0xa8] sm:$0xff] %v361_v21 }
  0x2b   : > { %364 = vst [vmem:[%s1982_s25 + $0xb0] sm:$0xff] %v363_v22  ;;  %366 = vst [vmem:[%s1982_s25 + $0xb8] sm:$0xff] %v365_v23  ;;  %v367_v24 = vld [vmem:[%s1977_s26 + $0x180] sm:$0xff]  ;;  %v369_v25 = vld [vmem:[%s1977_s26 + $0x190] sm:$0xff] }
  0x2c   : > { %v371_v26 = vld [vmem:[%s1977_s26 + $0x1a0] sm:$0xff]  ;;  %368 = vst [vmem:[%s1982_s25 + $0xc0] sm:$0xff] %v367_v24  ;;  %370 = vst [vmem:[%s1982_s25 + $0xc8] sm:$0xff] %v369_v25  ;;  %v373_v27 = vld [vmem:[%s1977_s26 + $0x1b0] sm:$0xff] }
  0x2d   : > { %372 = vst [vmem:[%s1982_s25 + $0xd0] sm:$0xff] %v371_v26  ;;  %v375_v28 = vld [vmem:[%s1977_s26 + $0x1c0] sm:$0xff]  ;;  %v377_v29 = vld [vmem:[%s1977_s26 + $0x1d0] sm:$0xff]  ;;  %374 = vst [vmem:[%s1982_s25 + $0xd8] sm:$0xff] %v373_v27 }
  0x2e   : > { %376 = vst [vmem:[%s1982_s25 + $0xe0] sm:$0xff] %v375_v28  ;;  %378 = vst [vmem:[%s1982_s25 + $0xe8] sm:$0xff] %v377_v29  ;;  %v379_v30 = vld [vmem:[%s1977_s26 + $0x1e0] sm:$0xff]  ;;  %v381_v31 = vld [vmem:[%s1977_s26 + $0x1f0] sm:$0xff] }
  0x2f   : > { %v383_v32 = vld [vmem:[%s1977_s26 + $0x200] sm:$0xff]  ;;  %380 = vst [vmem:[%s1982_s25 + $0xf0] sm:$0xff] %v379_v30  ;;  %382 = vst [vmem:[%s1982_s25 + $0xf8] sm:$0xff] %v381_v31  ;;  %v385_v33 = vld [vmem:[%s1977_s26 + $0x210] sm:$0xff] }
  0x30   : > { %384 = vst [vmem:[%s1982_s25 + $0x100] sm:$0xff] %v383_v32  ;;  %v387_v34 = vld [vmem:[%s1977_s26 + $0x220] sm:$0xff]  ;;  %v389_v35 = vld [vmem:[%s1977_s26 + $0x230] sm:$0xff]  ;;  %386 = vst [vmem:[%s1982_s25 + $0x108] sm:$0xff] %v385_v33 }
  0x31   : > { %388 = vst [vmem:[%s1982_s25 + $0x110] sm:$0xff] %v387_v34  ;;  %390 = vst [vmem:[%s1982_s25 + $0x118] sm:$0xff] %v389_v35  ;;  %v391_v36 = vld [vmem:[%s1977_s26 + $0x240] sm:$0xff]  ;;  %v393_v37 = vld [vmem:[%s1977_s26 + $0x250] sm:$0xff] }
  0x32   : > { %v395_v38 = vld [vmem:[%s1977_s26 + $0x260] sm:$0xff]  ;;  %392 = vst [vmem:[%s1982_s25 + $0x120] sm:$0xff] %v391_v36  ;;  %394 = vst [vmem:[%s1982_s25 + $0x128] sm:$0xff] %v393_v37  ;;  %v397_v39 = vld [vmem:[%s1977_s26 + $0x270] sm:$0xff] }
  0x33   : > { %396 = vst [vmem:[%s1982_s25 + $0x130] sm:$0xff] %v395_v38  ;;  %v399_v40 = vld [vmem:[%s1977_s26 + $0x280] sm:$0xff]  ;;  %v401_v41 = vld [vmem:[%s1977_s26 + $0x290] sm:$0xff]  ;;  %398 = vst [vmem:[%s1982_s25 + $0x138] sm:$0xff] %v397_v39 }
  0x34   : > { %400 = vst [vmem:[%s1982_s25 + $0x140] sm:$0xff] %v399_v40  ;;  %402 = vst [vmem:[%s1982_s25 + $0x148] sm:$0xff] %v401_v41  ;;  %v403_v42 = vld [vmem:[%s1977_s26 + $0x2a0] sm:$0xff]  ;;  %v405_v43 = vld [vmem:[%s1977_s26 + $0x2b0] sm:$0xff] }
  0x35   : > { %v407_v44 = vld [vmem:[%s1977_s26 + $0x2c0] sm:$0xff]  ;;  %404 = vst [vmem:[%s1982_s25 + $0x150] sm:$0xff] %v403_v42  ;;  %406 = vst [vmem:[%s1982_s25 + $0x158] sm:$0xff] %v405_v43  ;;  %v409_v45 = vld [vmem:[%s1977_s26 + $0x2d0] sm:$0xff] }
  0x36   : > { %408 = vst [vmem:[%s1982_s25 + $0x160] sm:$0xff] %v407_v44  ;;  %v411_v46 = vld [vmem:[%s1977_s26 + $0x2e0] sm:$0xff]  ;;  %v413_v47 = vld [vmem:[%s1977_s26 + $0x2f0] sm:$0xff]  ;;  %410 = vst [vmem:[%s1982_s25 + $0x168] sm:$0xff] %v409_v45 }
  0x37   : > { %412 = vst [vmem:[%s1982_s25 + $0x170] sm:$0xff] %v411_v46  ;;  %414 = vst [vmem:[%s1982_s25 + $0x178] sm:$0xff] %v413_v47  ;;  %v415_v48 = vld [vmem:[%s1977_s26 + $0x300] sm:$0xff]  ;;  %v417_v49 = vld [vmem:[%s1977_s26 + $0x310] sm:$0xff] }
  0x38   : > { %v419_v50 = vld [vmem:[%s1977_s26 + $0x320] sm:$0xff]  ;;  %416 = vst [vmem:[%s1982_s25 + $0x180] sm:$0xff] %v415_v48  ;;  %418 = vst [vmem:[%s1982_s25 + $0x188] sm:$0xff] %v417_v49  ;;  %v421_v51 = vld [vmem:[%s1977_s26 + $0x330] sm:$0xff] }
  0x39   : > { %420 = vst [vmem:[%s1982_s25 + $0x190] sm:$0xff] %v419_v50  ;;  %v423_v52 = vld [vmem:[%s1977_s26 + $0x340] sm:$0xff]  ;;  %v425_v53 = vld [vmem:[%s1977_s26 + $0x350] sm:$0xff]  ;;  %422 = vst [vmem:[%s1982_s25 + $0x198] sm:$0xff] %v421_v51 }
  0x3a   : > { %424 = vst [vmem:[%s1982_s25 + $0x1a0] sm:$0xff] %v423_v52  ;;  %426 = vst [vmem:[%s1982_s25 + $0x1a8] sm:$0xff] %v425_v53  ;;  %v427_v54 = vld [vmem:[%s1977_s26 + $0x360] sm:$0xff]  ;;  %v429_v55 = vld [vmem:[%s1977_s26 + $0x370] sm:$0xff] }
  0x3b   : > { %v431_v56 = vld [vmem:[%s1977_s26 + $0x380] sm:$0xff]  ;;  %428 = vst [vmem:[%s1982_s25 + $0x1b0] sm:$0xff] %v427_v54  ;;  %430 = vst [vmem:[%s1982_s25 + $0x1b8] sm:$0xff] %v429_v55  ;;  %v433_v57 = vld [vmem:[%s1977_s26 + $0x390] sm:$0xff] }
  0x3c   : > { %432 = vst [vmem:[%s1982_s25 + $0x1c0] sm:$0xff] %v431_v56  ;;  %v435_v58 = vld [vmem:[%s1977_s26 + $0x3a0] sm:$0xff]  ;;  %v437_v59 = vld [vmem:[%s1977_s26 + $0x3b0] sm:$0xff]  ;;  %434 = vst [vmem:[%s1982_s25 + $0x1c8] sm:$0xff] %v433_v57 }
  0x3d   : > { %436 = vst [vmem:[%s1982_s25 + $0x1d0] sm:$0xff] %v435_v58  ;;  %438 = vst [vmem:[%s1982_s25 + $0x1d8] sm:$0xff] %v437_v59  ;;  %v439_v60 = vld [vmem:[%s1977_s26 + $0x3c0] sm:$0xff]  ;;  %v441_v61 = vld [vmem:[%s1977_s26 + $0x3d0] sm:$0xff] }
  0x3e   : > { %v443_v62 = vld [vmem:[%s1977_s26 + $0x3e0] sm:$0xff]  ;;  %440 = vst [vmem:[%s1982_s25 + $0x1e0] sm:$0xff] %v439_v60  ;;  %442 = vst [vmem:[%s1982_s25 + $0x1e8] sm:$0xff] %v441_v61  ;;  %v445_v63 = vld [vmem:[%s1977_s26 + $0x3f0] sm:$0xff] }
  0x3f   : > { %444 = vst [vmem:[%s1982_s25 + $0x1f0] sm:$0xff] %v443_v62  ;;  %446 = vst [vmem:[%s1982_s25 + $0x1f8] sm:$0xff] %v445_v63 }
  0x40 PF: > { %p1477_p11 = scmp.ge.s32.totalorder %s1867_s20, 1  ;;  %p459_p12 = scmp.lt.s32.totalorder %s1867_s20, 19 }
  0x42   : > { %p460_p13 = pnand %p1477_p11, %p459_p12 }
  0x43   : > { %s466_s27 = sand.u32 (!%p460_p13), 1, %s1843_s14   ;;  %s494_s28 = sand.u32 (!%p460_p13), 1, %s1835_s12  }
  0x44   : > { %463 = sbr.rel (%p460_p13) target bundleno = 416 (0x1a0), region = 66  ;;  %s1478_s29 = sshll.u32 (!%p460_p13), %s466_s27, 9 }
  0x45   : > { %s1479_s6 = sshll.u32 (!%p460_p13), %s494_s28, 6  ;;  %p497_p0 = scmp.lt.s32.totalorder (!%p460_p13), %s1851_s16, 8 }
  0x46   : > { %s1482_s7 = sshll.u32 (!%p460_p13), %s1855_s17, 1  ;;  %s2127_s12 = scalar_lea.vmem (!%p460_p13), [#allocation3], %s1478_s29 }
  0x47   : > { %p504_p1 = scmp.lt.s32.totalorder (!%p460_p13), %s1482_s7, 3  ;;  %s2129_s25 = scalar_lea.vmem (!%p460_p13), [#allocation4], %s1479_s6 }
  0x48   : > { %p1483_p2 = scmp.ne.s32.totalorder (!%p460_p13), %s1851_s16, 0 }
  0x4b   : > { %s498_s8 = scalar_select %p497_p0, %s1851_s16, 8 }
  0x4c   : > { %s2288_s7 = smov (!%p504_p1, %s1482_s7), 3  ;;  %512 = sbr.rel (%p1483_p2) target bundleno = 86 (0x56), region = 74 }
  0x4d   : > { %s1578_s9 = sshll.u32 %s498_s8, 7  ;;  %s506_s14 = scalar_lea.vmem %s2269_s2, %s2288_s7  ;;  %v1869_v0 = vmov (!%p1483_p2), 0.0  }
  0x4e   : > { %s2121_s23 = scalar_lea.vmem %s2267_s0, %s1578_s9  ;;  %513 = vst [vmem:[#allocation2] sm:$0xff] (!%p1483_p2), %v1869_v0  ;;  %514 = vst [vmem:[#allocation2 + $0x8] sm:$0xff] (!%p1483_p2), %v1869_v0 }
  0x4f   : > { %515 = vst [vmem:[#allocation2 + $0x10] sm:$0xff] (!%p1483_p2), %v1869_v0  ;;  %516 = vst [vmem:[#allocation2 + $0x18] sm:$0xff] (!%p1483_p2), %v1869_v0 }
  0x50   : > { %517 = vst [vmem:[#allocation2 + $0x20] sm:$0xff] (!%p1483_p2), %v1869_v0  ;;  %518 = vst [vmem:[#allocation2 + $0x28] sm:$0xff] (!%p1483_p2), %v1869_v0 }
  0x51   : > { %519 = vst [vmem:[#allocation2 + $0x30] sm:$0xff] (!%p1483_p2), %v1869_v0  ;;  %520 = vst [vmem:[#allocation2 + $0x38] sm:$0xff] (!%p1483_p2), %v1869_v0 }
  0x52   : > { %521 = vst [vmem:[#allocation2 + $0x40] sm:$0xff] (!%p1483_p2), %v1869_v0  ;;  %522 = vst [vmem:[#allocation2 + $0x48] sm:$0xff] (!%p1483_p2), %v1869_v0 }
  0x53   : > { %523 = vst [vmem:[#allocation2 + $0x50] sm:$0xff] %v1869_v0  ;;  %524 = vst [vmem:[#allocation2 + $0x58] sm:$0xff] %v1869_v0 }
  0x54   : > { %525 = vst [vmem:[#allocation2 + $0x60] sm:$0xff] %v1869_v0  ;;  %526 = vst [vmem:[#allocation2 + $0x68] sm:$0xff] %v1869_v0 }
  0x55   : > { %527 = vst [vmem:[#allocation2 + $0x70] sm:$0xff] %v1869_v0  ;;  %528 = vst [vmem:[#allocation2 + $0x78] sm:$0xff] %v1869_v0 }
  0x56 PF: > { %v1677_v1 = vld [vmem:[%s2127_s12 + $0x4] ss:$8 sps:$4 sm:$0xff]   ;;  %v1681_v3 = vld [vmem:[%s2127_s12] ss:$8 sps:$4 sm:$0xff]   ;;  %v1683_v5 = vld [vmem:[%s2127_s12 + $0x14] ss:$8 sps:$4 sm:$0xff]  }
  0x57   : > { %v1679_v2 = vld [vmem:[%s2127_s12 + $0x104] ss:$8 sps:$4 sm:$0xff]   ;;  %1025 = vmatprep.subr.bf16.mxu1 %v1677_v1  ;;  %v1682_v4 = vld [vmem:[%s2127_s12 + $0x100] ss:$8 sps:$4 sm:$0xff]   ;;  %v1685_v6 = vld [vmem:[%s2127_s12 + $0x114] ss:$8 sps:$4 sm:$0xff]  }
  0x58   : > { %1098 = vmatprep.subr.bf16.mxu0 %v1679_v2  ;;  %1026 = vmatpush1.bf16.msra.mxu1 %v1681_v3  ;;  %v1687_v7 = vld [vmem:[%s2127_s12 + $0x10] ss:$8 sps:$4 sm:$0xff]   ;;  %v1689_v9 = vld [vmem:[%s2127_s12 + $0x24] ss:$8 sps:$4 sm:$0xff]   ;;  %v1693_v11 = vld [vmem:[%s2127_s12 + $0x20] ss:$8 sps:$4 sm:$0xff]  }
  0x59   : > { %1099 = vmatpush1.bf16.msra.mxu0 %v1682_v4  ;;  %1027 = vmatprep.subr.bf16.mxu1 %v1683_v5  ;;  %v1688_v8 = vld [vmem:[%s2127_s12 + $0x110] ss:$8 sps:$4 sm:$0xff]   ;;  %v1691_v10 = vld [vmem:[%s2127_s12 + $0x124] ss:$8 sps:$4 sm:$0xff]   ;;  %v1694_v12 = vld [vmem:[%s2127_s12 + $0x120] ss:$8 sps:$4 sm:$0xff]  }
  0x5a   : > { %1100 = vmatprep.subr.bf16.mxu0 %v1685_v6  ;;  %v1695_v13 = vld [vmem:[%s2127_s12 + $0x34] ss:$8 sps:$4 sm:$0xff]   ;;  %v1699_v15 = vld [vmem:[%s2127_s12 + $0x30] ss:$8 sps:$4 sm:$0xff]   ;;  %v1701_v17 = vld [vmem:[%s2127_s12 + $0x44] ss:$8 sps:$4 sm:$0xff]  }
  0x5b   : > { %v1697_v14 = vld [vmem:[%s2127_s12 + $0x134] ss:$8 sps:$4 sm:$0xff]   ;;  %v1700_v16 = vld [vmem:[%s2127_s12 + $0x130] ss:$8 sps:$4 sm:$0xff]   ;;  %v1703_v18 = vld [vmem:[%s2127_s12 + $0x144] ss:$8 sps:$4 sm:$0xff]  }
  0x5c   : > { %1028 = vmatpush1.bf16.msra.mxu1 %v1687_v7  ;;  %v1705_v19 = vld [vmem:[%s2127_s12 + $0x40] ss:$8 sps:$4 sm:$0xff]   ;;  %v1707_v21 = vld [vmem:[%s2127_s12 + $0x54] ss:$8 sps:$4 sm:$0xff]   ;;  %v1711_v23 = vld [vmem:[%s2127_s12 + $0x50] ss:$8 sps:$4 sm:$0xff]  }
  0x5d   : > { %1101 = vmatpush1.bf16.msra.mxu0 %v1688_v8  ;;  %1029 = vmatprep.subr.bf16.mxu1 %v1689_v9  ;;  %v1706_v20 = vld [vmem:[%s2127_s12 + $0x140] ss:$8 sps:$4 sm:$0xff]   ;;  %v1709_v22 = vld [vmem:[%s2127_s12 + $0x154] ss:$8 sps:$4 sm:$0xff]   ;;  %v1712_v24 = vld [vmem:[%s2127_s12 + $0x150] ss:$8 sps:$4 sm:$0xff]  }
  0x5e   : > { %1102 = vmatprep.subr.bf16.mxu0 %v1691_v10  ;;  %v1713_v25 = vld [vmem:[%s2127_s12 + $0x64] ss:$8 sps:$4 sm:$0xff]   ;;  %v1717_v27 = vld [vmem:[%s2127_s12 + $0x60] ss:$8 sps:$4 sm:$0xff]   ;;  %v1719_v29 = vld [vmem:[%s2127_s12 + $0x74] ss:$8 sps:$4 sm:$0xff]  }
  0x5f   : > { %v1715_v26 = vld [vmem:[%s2127_s12 + $0x164] ss:$8 sps:$4 sm:$0xff]   ;;  %v1718_v28 = vld [vmem:[%s2127_s12 + $0x160] ss:$8 sps:$4 sm:$0xff]   ;;  %v1721_v30 = vld [vmem:[%s2127_s12 + $0x174] ss:$8 sps:$4 sm:$0xff]  }
  0x60   : > { %1030 = vmatpush1.bf16.msra.mxu1 %v1693_v11  ;;  %v1723_v31 = vld [vmem:[%s2127_s12 + $0x70] ss:$8 sps:$4 sm:$0xff]   ;;  %v1725_v33 = vld [vmem:[%s2127_s12 + $0x84] ss:$8 sps:$4 sm:$0xff]   ;;  %v1729_v35 = vld [vmem:[%s2127_s12 + $0x80] ss:$8 sps:$4 sm:$0xff]  }
  0x61   : > { %1103 = vmatpush1.bf16.msra.mxu0 %v1694_v12  ;;  %1031 = vmatprep.subr.bf16.mxu1 %v1695_v13  ;;  %v1724_v32 = vld [vmem:[%s2127_s12 + $0x170] ss:$8 sps:$4 sm:$0xff]   ;;  %v1727_v34 = vld [vmem:[%s2127_s12 + $0x184] ss:$8 sps:$4 sm:$0xff]   ;;  %v1730_v36 = vld [vmem:[%s2127_s12 + $0x180] ss:$8 sps:$4 sm:$0xff]  }
  0x62   : > { %1104 = vmatprep.subr.bf16.mxu0 %v1697_v14  ;;  %v1731_v37 = vld [vmem:[%s2127_s12 + $0x94] ss:$8 sps:$4 sm:$0xff]   ;;  %v1735_v39 = vld [vmem:[%s2127_s12 + $0x90] ss:$8 sps:$4 sm:$0xff]   ;;  %v1737_v41 = vld [vmem:[%s2127_s12 + $0xa4] ss:$8 sps:$4 sm:$0xff]  }
  0x63   : > { %v1733_v38 = vld [vmem:[%s2127_s12 + $0x194] ss:$8 sps:$4 sm:$0xff]   ;;  %v1736_v40 = vld [vmem:[%s2127_s12 + $0x190] ss:$8 sps:$4 sm:$0xff]   ;;  %v1739_v42 = vld [vmem:[%s2127_s12 + $0x1a4] ss:$8 sps:$4 sm:$0xff]  }
  0x64   : > { %1032 = vmatpush1.bf16.msra.mxu1 %v1699_v15  ;;  %v1741_v43 = vld [vmem:[%s2127_s12 + $0xa0] ss:$8 sps:$4 sm:$0xff]   ;;  %v1743_v45 = vld [vmem:[%s2127_s12 + $0xb4] ss:$8 sps:$4 sm:$0xff]   ;;  %v1747_v47 = vld [vmem:[%s2127_s12 + $0xb0] ss:$8 sps:$4 sm:$0xff]  }
  0x65   : > { %1105 = vmatpush1.bf16.msra.mxu0 %v1700_v16  ;;  %1033 = vmatprep.subr.bf16.mxu1 %v1701_v17  ;;  %v1742_v44 = vld [vmem:[%s2127_s12 + $0x1a0] ss:$8 sps:$4 sm:$0xff]   ;;  %v1745_v46 = vld [vmem:[%s2127_s12 + $0x1b4] ss:$8 sps:$4 sm:$0xff]   ;;  %v1748_v48 = vld [vmem:[%s2127_s12 + $0x1b0] ss:$8 sps:$4 sm:$0xff]  }
  0x66   : > { %1106 = vmatprep.subr.bf16.mxu0 %v1703_v18  ;;  %v1749_v49 = vld [vmem:[%s2127_s12 + $0xc4] ss:$8 sps:$4 sm:$0xff]   ;;  %v1753_v53 = vld [vmem:[%s2127_s12 + $0xc0] ss:$8 sps:$4 sm:$0xff]   ;;  %v1755_v55 = vld [vmem:[%s2127_s12 + $0xd4] ss:$8 sps:$4 sm:$0xff]  }
  0x67   : > { %v1775_v50 = vld [vmem:[%s2121_s23 + $0x4] ss:$16 sps:$4 sm:$0xff]   ;;  %v1778_v52 = vld [vmem:[%s2121_s23 + $0xc] ss:$16 sps:$4 sm:$0xff]   ;;  %v1754_v54 = vld [vmem:[%s2127_s12 + $0x1c0] ss:$8 sps:$4 sm:$0xff]  }
  0x68   : > { %1034 = vmatpush1.bf16.msra.mxu1 %v1705_v19  ;;  %v1751_v51 = vld [vmem:[%s2127_s12 + $0x1c4] ss:$8 sps:$4 sm:$0xff]   ;;  %1057 = vmatprep.mubr.bf16.mxu1 %v1775_v50  ;;  %v1757_v56 = vld [vmem:[%s2127_s12 + $0x1d4] ss:$8 sps:$4 sm:$0xff]   ;;  %v1759_v57 = vld [vmem:[%s2127_s12 + $0xd0] ss:$8 sps:$4 sm:$0xff]  }
  0x69   : > { %1107 = vmatpush1.bf16.msra.mxu0 %v1706_v20  ;;  %1035 = vmatprep.subr.bf16.mxu1 %v1707_v21  ;;  %v1760_v58 = vld [vmem:[%s2127_s12 + $0x1d0] ss:$8 sps:$4 sm:$0xff]   ;;  %v1761_v59 = vld [vmem:[%s2127_s12 + $0xe4] ss:$8 sps:$4 sm:$0xff]   ;;  %v1765_v61 = vld [vmem:[%s2127_s12 + $0xe0] ss:$8 sps:$4 sm:$0xff]  }
  0x6a   : > { %1108 = vmatprep.subr.bf16.mxu0 %v1709_v22  ;;  %1130 = vmatprep.mubr.bf16.mxu0 %v1778_v52  ;;  %v1763_v60 = vld [vmem:[%s2127_s12 + $0x1e4] ss:$8 sps:$4 sm:$0xff]   ;;  %v1766_v62 = vld [vmem:[%s2127_s12 + $0x1e0] ss:$8 sps:$4 sm:$0xff]   ;;  %v1767_v63 = vld [vmem:[%s2127_s12 + $0xf4] ss:$8 sps:$4 sm:$0xff]  }
  0x6b   : > { %v1769_v0 = vld [vmem:[%s2127_s12 + $0x1f4] ss:$8 sps:$4 sm:$0xff]   ;;  %v1771_v1 = vld [vmem:[%s2127_s12 + $0xf0] ss:$8 sps:$4 sm:$0xff]   ;;  %v529_v18 = vld [vmem:[#allocation2] sm:$0xff]  ;;  %p1564_p3 = scmp.ne.s32.totalorder %s1851_s16, 8 }
  0x6c   : > { %1036 = vmatpush1.bf16.msra.mxu1 %v1711_v23  ;;  %v1772_v2 = vld [vmem:[%s2127_s12 + $0x1f0] ss:$8 sps:$4 sm:$0xff]   ;;  %v1779_v5 = vld [vmem:[%s2121_s23 + $0x24] ss:$16 sps:$4 sm:$0xff]   ;;  %v1781_v6 = vld [vmem:[%s2121_s23 + $0x2c] ss:$16 sps:$4 sm:$0xff]  }
  0x6d   : > { %1109 = vmatpush1.bf16.msra.mxu0 %v1712_v24  ;;  %1037 = vmatprep.subr.bf16.mxu1 %v1713_v25  ;;  %v1773_v3 = vld [vmem:[%s2121_s23] ss:$16 sps:$4 sm:$0xff]   ;;  %v1776_v4 = vld [vmem:[%s2121_s23 + $0x8] ss:$16 sps:$4 sm:$0xff]   ;;  %v1785_v9 = vld [vmem:[%s2121_s23 + $0x44] ss:$16 sps:$4 sm:$0xff]  }
  0x6e   : > { %1110 = vmatprep.subr.bf16.mxu0 %v1715_v26  ;;  %v1783_v7 = vld [vmem:[%s2121_s23 + $0x20] ss:$16 sps:$4 sm:$0xff]   ;;  %v1784_v8 = vld [vmem:[%s2121_s23 + $0x28] ss:$16 sps:$4 sm:$0xff]   ;;  %v1787_v10 = vld [vmem:[%s2121_s23 + $0x4c] ss:$16 sps:$4 sm:$0xff]  }
  0x6f   : > { %v1789_v11 = vld [vmem:[%s2121_s23 + $0x40] ss:$16 sps:$4 sm:$0xff]   ;;  %v1790_v12 = vld [vmem:[%s2121_s23 + $0x48] ss:$16 sps:$4 sm:$0xff]   ;;  %v1791_v13 = vld [vmem:[%s2121_s23 + $0x64] ss:$16 sps:$4 sm:$0xff]  }
  0x70   : > { %1038 = vmatpush1.bf16.msra.mxu1 %v1717_v27  ;;  %v1793_v14 = vld [vmem:[%s2121_s23 + $0x6c] ss:$16 sps:$4 sm:$0xff]   ;;  %v1795_v15 = vld [vmem:[%s2121_s23 + $0x60] ss:$16 sps:$4 sm:$0xff]   ;;  %v1796_v16 = vld [vmem:[%s2121_s23 + $0x68] ss:$16 sps:$4 sm:$0xff]  }
  0x71   : > { %1111 = vmatpush1.bf16.msra.mxu0 %v1718_v28  ;;  %1039 = vmatprep.subr.bf16.mxu1 %v1719_v29  ;;  %v530_v22 = vld [vmem:[#allocation2 + $0x8] sm:$0xff]  ;;  %v531_v26 = vld [vmem:[#allocation2 + $0x10] sm:$0xff] }
  0x72   : > { %1112 = vmatprep.subr.bf16.mxu0 %v1721_v30 }
  0x74   : > { %1040 = vmatpush1.bf16.msra.mxu1 %v1723_v31  ;;  %v532_v31 = vld [vmem:[#allocation2 + $0x18] sm:$0xff] }
  0x75   : > { %1113 = vmatpush1.bf16.msra.mxu0 %v1724_v32  ;;  %1041 = vmatprep.subr.bf16.mxu1 %v1725_v33 }
  0x76   : > { %1114 = vmatprep.subr.bf16.mxu0 %v1727_v34 }
  0x78   : > { %1042 = vmatpush1.bf16.msra.mxu1 %v1729_v35 }
  0x79   : > { %1115 = vmatpush1.bf16.msra.mxu0 %v1730_v36  ;;  %1043 = vmatprep.subr.bf16.mxu1 %v1731_v37 }
  0x7a   : > { %1116 = vmatprep.subr.bf16.mxu0 %v1733_v38  ;;  %v533_v38 = vld [vmem:[#allocation2 + $0x20] sm:$0xff] }
  0x7c   : > { %1044 = vmatpush1.bf16.msra.mxu1 %v1735_v39 }
  0x7d   : > { %1117 = vmatpush1.bf16.msra.mxu0 %v1736_v40  ;;  %1045 = vmatprep.subr.bf16.mxu1 %v1737_v41 }
  0x7e   : > { %1118 = vmatprep.subr.bf16.mxu0 %v1739_v42  ;;  %v534_v42 = vld [vmem:[#allocation2 + $0x28] sm:$0xff] }
  0x80   : > { %1046 = vmatpush1.bf16.msra.mxu1 %v1741_v43 }
  0x81   : > { %1119 = vmatpush1.bf16.msra.mxu0 %v1742_v44  ;;  %1047 = vmatprep.subr.bf16.mxu1 %v1743_v45 }
  0x82   : > { %1120 = vmatprep.subr.bf16.mxu0 %v1745_v46  ;;  %v535_v46 = vld [vmem:[#allocation2 + $0x30] sm:$0xff] }
  0x84   : > { %1048 = vmatpush1.bf16.msra.mxu1 %v1747_v47 }
  0x85   : > { %1121 = vmatpush1.bf16.msra.mxu0 %v1748_v48  ;;  %1049 = vmatprep.subr.bf16.mxu1 %v1749_v49 }
  0x86   : > { %1122 = vmatprep.subr.bf16.mxu0 %v1751_v51  ;;  %v536_v51 = vld [vmem:[#allocation2 + $0x38] sm:$0xff] }
  0x88   : > { %1050 = vmatpush1.bf16.msra.mxu1 %v1753_v53 }
  0x89   : > { %1123 = vmatpush1.bf16.msra.mxu0 %v1754_v54  ;;  %1051 = vmatprep.subr.bf16.mxu1 %v1755_v55 }
  0x8a   : > { %1124 = vmatprep.subr.bf16.mxu0 %v1757_v56 }
  0x8c   : > { %1052 = vmatpush1.bf16.msra.mxu1 %v1759_v57 }
  0x8d   : > { %1125 = vmatpush1.bf16.msra.mxu0 %v1760_v58  ;;  %1053 = vmatprep.subr.bf16.mxu1 %v1761_v59  ;;  %v537_v58 = vld [vmem:[#allocation2 + $0x40] sm:$0xff] }
  0x8e   : > { %1126 = vmatprep.subr.bf16.mxu0 %v1763_v60 }
  0x90   : > { %1054 = vmatpush1.bf16.msra.mxu1 %v1765_v61 }
  0x91   : > { %1127 = vmatpush1.bf16.msra.mxu0 %v1766_v62  ;;  %1055 = vmatprep.subr.bf16.mxu1 %v1767_v63  ;;  %v538_v62 = vld [vmem:[#allocation2 + $0x48] sm:$0xff] }
  0x92   : > { %1128 = vmatprep.subr.bf16.mxu0 %v1769_v0 }
  0x94   : > { %1056 = vmatpush1.bf16.msra.mxu1 %v1771_v1 }
  0x95   : > { %1129 = vmatpush1.bf16.msra.mxu0 %v1772_v2  ;;  %v539_v2 = vld [vmem:[#allocation2 + $0x50] sm:$0xff] }
  0x97   : > { %1058 = vmatmul.mubr.bf16.vlgmr.msra.gmra.mrb[0].mxu1 %v1773_v3 }
  0x98   : > { %1131 = vmatmul.mubr.bf16.vlgmr.msra.gmra.mrb[0].mxu0 %v1776_v4  ;;  %1067 = vmatprep.mubr.bf16.mxu1 %v1779_v5 }
  0x99   : > { %1140 = vmatprep.mubr.bf16.mxu0 %v1781_v6 }
  0x9f   : > { %1068 = vmatmul.mubr.bf16.gmra.mrb[4].mxu1 %v1783_v7  ;;  %v540_v7 = vld [vmem:[#allocation2 + $0x58] sm:$0xff] }
  0xa0   : > { %1141 = vmatmul.mubr.bf16.gmra.mrb[4].mxu0 %v1784_v8  ;;  %1077 = vmatprep.mubr.bf16.mxu1 %v1785_v9 }
  0xa1   : > { %1150 = vmatprep.mubr.bf16.mxu0 %v1787_v10 }
  0xa7   : > { %1078 = vmatmul.mubr.bf16.gmra.mrb[8].mxu1 %v1789_v11 }
  0xa8   : > { %1151 = vmatmul.mubr.bf16.gmra.mrb[8].mxu0 %v1790_v12  ;;  %1087 = vmatprep.mubr.bf16.mxu1 %v1791_v13 }
  0xa9   : > { %1160 = vmatprep.mubr.bf16.mxu0 %v1793_v14  ;;  %v541_v14 = vld [vmem:[#allocation2 + $0x60] sm:$0xff] }
  0xaf   : > { %1088 = vmatmul.mubr.bf16.gmra.mrb[12].mxu1 %v1795_v15 }
  0xb0   : > { %1161 = vmatmul.mubr.bf16.gmra.mrb[12].mxu0 %v1796_v16 }
 0x16a   : > { %v1059_v17 = vpop.f32.mrb[0].mxu1 }
 0x16b   : > { %v1132_v19 = vpop.f32.mrb[0].mxu0  ;;  %v1061_v21 = vpop.f32.mrb[1].mxu1 }
 0x16c   : > { %v1133_v20 = vadd.f32 %v1132_v19, %v1059_v17  ;;  %v1134_v23 = vpop.f32.mrb[1].mxu0  ;;  %v1063_v25 = vpop.f32.mrb[2].mxu1 }
 0x16d   : > { %v1135_v24 = vadd.f32 %v1134_v23, %v1061_v21  ;;  %v1136_v27 = vpop.f32.mrb[2].mxu0  ;;  %v1065_v30 = vpop.f32.mrb[3].mxu1 }
 0x16e   : > { %v1171_v28 = vadd.f32 %v1133_v20, %v529_v18  ;;  %v1137_v29 = vadd.f32 %v1136_v27, %v1063_v25  ;;  %v1138_v32 = vpop.f32.mrb[3].mxu0  ;;  %v542_v18 = vld [vmem:[#allocation2 + $0x68] sm:$0xff]  ;;  %v544_v27 = vld [vmem:[#allocation2 + $0x78] sm:$0xff] }
 0x16f   : > { %v1172_v33 = vadd.f32 %v1135_v24, %v530_v22  ;;  %v1139_v34 = vadd.f32 %v1138_v32, %v1065_v30  ;;  %v543_v22 = vld [vmem:[#allocation2 + $0x70] sm:$0xff] }
 0x170   : > { %1187 = vst [vmem:[#allocation2] sm:$0xff] %v1171_v28  ;;  %v1173_v35 = vadd.f32 %v1137_v29, %v531_v26 }
 0x171   : > { %1188 = vst [vmem:[#allocation2 + $0x8] sm:$0xff] %v1172_v33  ;;  %v1174_v36 = vadd.f32 %v1139_v34, %v532_v31  ;;  %v1225_v33 = vlaneseq (!%p1564_p3) }
 0x172   : > { %1189 = vst [vmem:[#allocation2 + $0x10] sm:$0xff] %v1173_v35  ;;  %v1069_v37 = vpop.f32.mrb[4].mxu1  ;;  %v1223_v35 = vld [vmem:[%s506_s14] sm:$0x3] (!%p1564_p3) }
 0x173   : > { %1190 = vst [vmem:[#allocation2 + $0x18] sm:$0xff] %v1174_v36  ;;  %v1142_v39 = vpop.f32.mrb[4].mxu0  ;;  %v1071_v41 = vpop.f32.mrb[5].mxu1  ;;  %v1226_v34 = vshrl.u32 (!%p1564_p3), %v1225_v33, 7 }
 0x174   : > { %v1143_v40 = vadd.f32 %v1142_v39, %v1069_v37  ;;  %v1144_v43 = vpop.f32.mrb[5].mxu0  ;;  %v1073_v45 = vpop.f32.mrb[6].mxu1 }
 0x175   : > { %v1145_v44 = vadd.f32 %v1144_v43, %v1071_v41  ;;  %v1146_v47 = vpop.f32.mrb[6].mxu0  ;;  %v1075_v50 = vpop.f32.mrb[7].mxu1  ;;  %v1231_v39 = vsub.s32 (!%p1564_p3), 1, %v1226_v34 }
 0x176   : > { %v1175_v48 = vadd.f32 %v1143_v40, %v533_v38  ;;  %v1147_v49 = vadd.f32 %v1146_v47, %v1073_v45  ;;  %v1148_v52 = vpop.f32.mrb[7].mxu0  ;;  %v1227_v38 = vsub.s32 (!%p1564_p3), 0, %v1226_v34 }
 0x177   : > { %v1176_v53 = vadd.f32 %v1145_v44, %v534_v42  ;;  %v1149_v54 = vadd.f32 %v1148_v52, %v1075_v50  ;;  %v1207_v36 = vld [vmem:[#allocation2] sm:$0xff] (!%p1564_p3)  ;;  %v1232_v44 = vrot.slane (!%p1564_p3), %v1223_v35, %v1231_v39 }
 0x178   : > { %1191 = vst [vmem:[#allocation2 + $0x20] sm:$0xff] %v1175_v48  ;;  %v1177_v55 = vadd.f32 %v1147_v49, %v535_v46  ;;  %v1208_v37 = vld [vmem:[#allocation2 + $0x8] sm:$0xff] (!%p1564_p3)  ;;  %v1228_v43 = vrot.slane (!%p1564_p3), %v1223_v35, %v1227_v38 }
 0x179   : > { %1192 = vst [vmem:[#allocation2 + $0x28] sm:$0xff] %v1176_v53  ;;  %v1178_v56 = vadd.f32 %v1149_v54, %v536_v51  ;;  %v1209_v40 = vld [vmem:[#allocation2 + $0x10] sm:$0xff] (!%p1564_p3)  ;;  %v1236_v51 = vadd.f32 (!%p1564_p3), %v1232_v44, %v1208_v37 }
 0x17a   : > { %1193 = vst [vmem:[#allocation2 + $0x30] sm:$0xff] %v1177_v55  ;;  %v1079_v57 = vpop.f32.mrb[8].mxu1  ;;  %v1210_v41 = vld [vmem:[#allocation2 + $0x18] sm:$0xff] (!%p1564_p3)  ;;  %v1235_v50 = vadd.f32 (!%p1564_p3), %v1228_v43, %v1207_v36  ;;  %v1237_v52 = vadd.f32 (!%p1564_p3), %v1228_v43, %v1209_v40 }
 0x17b   : > { %1194 = vst [vmem:[#allocation2 + $0x38] sm:$0xff] %v1178_v56  ;;  %v1152_v59 = vpop.f32.mrb[8].mxu0  ;;  %v1081_v61 = vpop.f32.mrb[9].mxu1  ;;  %v1238_v53 = vadd.f32 (!%p1564_p3), %v1232_v44, %v1210_v41 }
 0x17c   : > { %v1153_v60 = vadd.f32 %v1152_v59, %v1079_v57  ;;  %v1154_v63 = vpop.f32.mrb[9].mxu0  ;;  %v1083_v1 = vpop.f32.mrb[10].mxu1 }
 0x17d   : > { %v1155_v0 = vadd.f32 %v1154_v63, %v1081_v61  ;;  %v1156_v3 = vpop.f32.mrb[10].mxu0  ;;  %v1085_v6 = vpop.f32.mrb[11].mxu1  ;;  %v1579_v63 = vpack.c.bf16 (!%p1564_p3), %v1236_v51, %v1235_v50 }
 0x17e   : > { %v1179_v4 = vadd.f32 %v1153_v60, %v537_v58  ;;  %v1157_v5 = vadd.f32 %v1156_v3, %v1083_v1  ;;  %v1158_v8 = vpop.f32.mrb[11].mxu0 }
 0x17f   : > { %v1180_v9 = vadd.f32 %v1155_v0, %v538_v62  ;;  %v1159_v10 = vadd.f32 %v1158_v8, %v1085_v6  ;;  %v1211_v42 = vld [vmem:[#allocation2 + $0x20] sm:$0xff] (!%p1564_p3)  ;;  %v1580_v0 = vpack.c.bf16 (!%p1564_p3), %v1238_v53, %v1237_v52  ;;  %1299 = vst [vmem:[%s2129_s25] sm:$0xff] (!%p1564_p3), %v1579_v63 }
 0x180   : > { %1195 = vst [vmem:[#allocation2 + $0x40] sm:$0xff] %v1179_v4  ;;  %v1181_v11 = vadd.f32 %v1157_v5, %v539_v2  ;;  %v1212_v45 = vld [vmem:[#allocation2 + $0x28] sm:$0xff] (!%p1564_p3)  ;;  %v1239_v56 = vadd.f32 (!%p1564_p3), %v1228_v43, %v1211_v42 }
 0x181   : > { %1196 = vst [vmem:[#allocation2 + $0x48] sm:$0xff] %v1180_v9  ;;  %v1182_v12 = vadd.f32 %v1159_v10, %v540_v7  ;;  %v1213_v46 = vld [vmem:[#allocation2 + $0x30] sm:$0xff] (!%p1564_p3)  ;;  %v1240_v57 = vadd.f32 (!%p1564_p3), %v1232_v44, %v1212_v45  ;;  %1300 = vst [vmem:[%s2129_s25 + $0x8] sm:$0xff] (!%p1564_p3), %v1580_v0 }
 0x182   : > { %1197 = vst [vmem:[#allocation2 + $0x50] sm:$0xff] %v1181_v11  ;;  %v1089_v13 = vpop.f32.mrb[12].mxu1  ;;  %v1214_v47 = vld [vmem:[#allocation2 + $0x38] sm:$0xff] (!%p1564_p3)  ;;  %v1241_v58 = vadd.f32 (!%p1564_p3), %v1228_v43, %v1213_v46 }
 0x183   : > { %1198 = vst [vmem:[#allocation2 + $0x58] sm:$0xff] %v1182_v12  ;;  %v1162_v15 = vpop.f32.mrb[12].mxu0  ;;  %v1091_v17 = vpop.f32.mrb[13].mxu1  ;;  %v1242_v59 = vadd.f32 (!%p1564_p3), %v1232_v44, %v1214_v47  ;;  %v1581_v4 = vpack.c.bf16 (!%p1564_p3), %v1240_v57, %v1239_v56 }
 0x184   : > { %v1163_v16 = vadd.f32 %v1162_v15, %v1089_v13  ;;  %v1164_v19 = vpop.f32.mrb[13].mxu0  ;;  %v1093_v21 = vpop.f32.mrb[14].mxu1 }
 0x185   : > { %v1165_v20 = vadd.f32 %v1164_v19, %v1091_v17  ;;  %v1166_v23 = vpop.f32.mrb[14].mxu0  ;;  %v1095_v26 = vpop.f32.mrb[15].mxu1  ;;  %1206 = sbr.rel (%p1564_p3) target bundleno = 408 (0x198), region = 78  ;;  %v1582_v5 = vpack.c.bf16 (!%p1564_p3), %v1242_v59, %v1241_v58  ;;  %1301 = vst [vmem:[%s2129_s25 + $0x10] sm:$0xff] (!%p1564_p3), %v1581_v4 }
 0x186   : > { %v1183_v24 = vadd.f32 %v1163_v16, %v541_v14  ;;  %v1167_v25 = vadd.f32 %v1166_v23, %v1093_v21  ;;  %v1168_v28 = vpop.f32.mrb[15].mxu0 }
 0x187   : > { %v1184_v29 = vadd.f32 %v1165_v20, %v542_v18  ;;  %v1169_v30 = vadd.f32 %v1168_v28, %v1095_v26  ;;  %v1215_v48 = vld [vmem:[#allocation2 + $0x40] sm:$0xff] (!%p1564_p3)  ;;  %1302 = vst [vmem:[%s2129_s25 + $0x18] sm:$0xff] (!%p1564_p3), %v1582_v5 }
 0x188   : > { %1199 = vst [vmem:[#allocation2 + $0x60] sm:$0xff] %v1183_v24  ;;  %v1185_v31 = vadd.f32 %v1167_v25, %v543_v22  ;;  %v1216_v49 = vld [vmem:[#allocation2 + $0x48] sm:$0xff] (!%p1564_p3)  ;;  %v1243_v1 = vadd.f32 (!%p1564_p3), %v1228_v43, %v1215_v48 }
 0x189   : > { %1200 = vst [vmem:[#allocation2 + $0x68] sm:$0xff] %v1184_v29  ;;  %v1186_v32 = vadd.f32 %v1169_v30, %v544_v27  ;;  %v1217_v54 = vld [vmem:[#allocation2 + $0x50] sm:$0xff] (!%p1564_p3)  ;;  %v1244_v2 = vadd.f32 (!%p1564_p3), %v1232_v44, %v1216_v49 }
 0x18a   : > { %1201 = vst [vmem:[#allocation2 + $0x70] sm:$0xff] %v1185_v31  ;;  %v1218_v55 = vld [vmem:[#allocation2 + $0x58] sm:$0xff] (!%p1564_p3)  ;;  %v1245_v6 = vadd.f32 (!%p1564_p3), %v1228_v43, %v1217_v54 }
 0x18b   : > { %1202 = vst [vmem:[#allocation2 + $0x78] sm:$0xff] %v1186_v32  ;;  %v1246_v7 = vadd.f32 (!%p1564_p3), %v1232_v44, %v1218_v55  ;;  %v1583_v8 = vpack.c.bf16 (!%p1564_p3), %v1244_v2, %v1243_v1 }
 0x18d   : > { %v1584_v12 = vpack.c.bf16 %v1246_v7, %v1245_v6  ;;  %1303 = vst [vmem:[%s2129_s25 + $0x20] sm:$0xff] %v1583_v8 }
 0x18f   : > { %v1219_v60 = vld [vmem:[#allocation2 + $0x60] sm:$0xff]  ;;  %1304 = vst [vmem:[%s2129_s25 + $0x28] sm:$0xff] %v1584_v12 }
 0x190   : > { %v1220_v61 = vld [vmem:[#allocation2 + $0x68] sm:$0xff]  ;;  %v1247_v9 = vadd.f32 %v1228_v43, %v1219_v60 }
 0x191   : > { %v1221_v62 = vld [vmem:[#allocation2 + $0x70] sm:$0xff]  ;;  %v1248_v10 = vadd.f32 %v1232_v44, %v1220_v61 }
 0x192   : > { %v1222_v3 = vld [vmem:[#allocation2 + $0x78] sm:$0xff]  ;;  %v1249_v11 = vadd.f32 %v1228_v43, %v1221_v62 }
 0x193   : > { %v1250_v13 = vadd.f32 %v1232_v44, %v1222_v3  ;;  %v1585_v14 = vpack.c.bf16 %v1248_v10, %v1247_v9 }
 0x195   : > { %v1586_v15 = vpack.c.bf16 %v1250_v13, %v1249_v11  ;;  %1305 = vst [vmem:[%s2129_s25 + $0x30] sm:$0xff] %v1585_v14 }
 0x197   : > { %1306 = vst [vmem:[%s2129_s25 + $0x38] sm:$0xff] %v1586_v15 }
 0x198 PF: > { %1313 = sbr.rel (!%p1958_p9) target bundleno = 416 (0x1a0), region = 82  ;;  %s1587_s16 = sshll.u32 (%p1958_p9), %s1855_s17, 3  ;;  %v1358_v16 = vld [vmem:[%s2129_s25] sm:$0xff] (%p1958_p9)  ;;  %v1360_v17 = vld [vmem:[%s2129_s25 + $0x8] sm:$0xff] (%p1958_p9)  ;;  %v1362_v18 = vld [vmem:[%s2129_s25 + $0x10] sm:$0xff] (%p1958_p9) }
 0x199   : > { %s1316_s7 = scalar_lea.vmem (%p1958_p9), %s2270_s3, %s1587_s16  ;;  %v1366_v20 = vld [vmem:[%s2129_s25 + $0x20] sm:$0xff] (%p1958_p9)  ;;  %v1368_v21 = vld [vmem:[%s2129_s25 + $0x28] sm:$0xff] (%p1958_p9) }
 0x19a   : > { %v1364_v19 = vld [vmem:[%s2129_s25 + $0x18] sm:$0xff] (%p1958_p9)  ;;  %1359 = vst [vmem:[%s1316_s7] sm:$0xff] (%p1958_p9), %v1358_v16  ;;  %1361 = vst [vmem:[%s1316_s7 + $0x10] sm:$0xff] (%p1958_p9), %v1360_v17 }
 0x19b   : > { %1363 = vst [vmem:[%s1316_s7 + $0x20] sm:$0xff] (%p1958_p9), %v1362_v18  ;;  %1365 = vst [vmem:[%s1316_s7 + $0x30] sm:$0xff] (%p1958_p9), %v1364_v19 }
 0x19c   : > { %1367 = vst [vmem:[%s1316_s7 + $0x40] sm:$0xff] (%p1958_p9), %v1366_v20  ;;  %1369 = vst [vmem:[%s1316_s7 + $0x50] sm:$0xff] (%p1958_p9), %v1368_v21  ;;  %v1370_v22 = vld [vmem:[%s2129_s25 + $0x30] sm:$0xff] (%p1958_p9) }
 0x19d   : > { %1371 = vst [vmem:[%s1316_s7 + $0x60] sm:$0xff] (%p1958_p9), %v1370_v22 }
 0x19e   : > { %v1372_v23 = vld [vmem:[%s2129_s25 + $0x38] sm:$0xff] (%p1958_p9) }
 0x19f   : > { %1373 = vst [vmem:[%s1316_s7 + $0x70] sm:$0xff] %v1372_v23 }
 0x1a0 PF: > { %s13_s20 = sadd.s32 1, %s1867_s20   ;;  %s2273_s12 = smov %s1839_s13 }
 0x1a1   : > { %p10_p4 = scmp.ge.s32.totalorder %s13_s20, 20   ;;  %s2274_s13 = smov %s1963_s4 }
 0x1a2   : > { %s2275_s14 = smov %s1847_s15  ;;  %s2276_s15 = smov %s1966_s5 }
 0x1a3   : > { %s2277_s16 = smov %s1859_s18  ;;  %s2278_s17 = smov %s1863_s19 }
 0x1a4   : > { %s2279_s18 = smov %s2282_s21  ;;  %s2280_s19 = smov %s2286_s22 }
 0x1a5   :  { %12 = sbr.rel (!%p10_p4) target bundleno = 5 (0x5), region = 157 }

// kernel: toy_fasterrcnn_forward.3
= control target key start
LH: loop header
LB: loop body
LE: loop exit
PB: predicated region body
PF: predicated region fallthrough
CT: control target
= control target key end

     0   :  { %s1140_s12 = smov 0   ;;  %s1142_s13 = smov 0   ;;  %s1258_s0 = inlined_call_operand.vmem [shape: bf16[9,64,512], index: 0, kind: input, shape index: {}]   ;;  %s1259_s1 = inlined_call_operand.vmem [shape: bf16[9,512,128], index: 1, kind: input, shape index: {}]   ;;  %s1260_s2 = inlined_call_operand.vmem [shape: f32[1,128], index: 2, kind: input, shape index: {}]   ;;  %s1261_s3 = inlined_call_operand.vmem [shape: f32[64,128], index: 3, kind: output, shape index: {}]  }
   0x1   :  { %s1144_s14 = smov 0  }
   0x2 LB: > { %s22_s15 = sadd.s32 1, %s1113_s13  ;;  %p873_p0 = scmp.ge.s32.totalorder %s1117_s14, 1  ;;  %s1117_s14 = sphi %s1144_s14, %s13_s14   ;;  %s1113_s13 = sphi %s1142_s13, %s1263_s13   ;;  %s1109_s12 = sphi %s1140_s12, %s1262_s12  }
   0x3   : > { %p23_p1 = scmp.ge.s32.totalorder %s22_s15, 9  ;;  %p172_p2 = scmp.lt.s32.totalorder %s1117_s14, 10 }
   0x5   : > { %s1265_s15 = smov (%p23_p1, %s22_s15), 0  ;;  %p173_p3 = pnand %p873_p0, %p172_p2 }
   0x6   : > { %p206_p4 = scmp.lt.s32.totalorder (!%p173_p3), %s1109_s12, 8  ;;  %p878_p5 = scmp.ne.s32.totalorder (!%p173_p3), %s1109_s12, 0 }
   0x7   : > { %176 = sbr.rel (%p173_p3) target bundleno = 313 (0x139), region = 32 }
   0xe   : > { %s207_s16 = scalar_select %p206_p4, %s1109_s12, 8 }
   0xf   : > { %230 = sbr.rel (%p878_p5) target bundleno = 22 (0x16), region = 36  ;;  %v1119_v0 = vmov (!%p878_p5), 0.0  }
  0x10   : > { %s932_s17 = sshll.u32 %s207_s16, 7  ;;  %s933_s18 = sshll.u32 %s207_s16, 8  ;;  %231 = vst [vmem:[#allocation2] sm:$0xff] (!%p878_p5), %v1119_v0  ;;  %232 = vst [vmem:[#allocation2 + $0x8] sm:$0xff] (!%p878_p5), %v1119_v0 }
  0x11   : > { %s1165_s21 = scalar_lea.vmem %s1258_s0, %s932_s17  ;;  %s1170_s24 = scalar_lea.vmem %s1259_s1, %s933_s18  ;;  %233 = vst [vmem:[#allocation2 + $0x10] sm:$0xff] (!%p878_p5), %v1119_v0  ;;  %234 = vst [vmem:[#allocation2 + $0x18] sm:$0xff] (!%p878_p5), %v1119_v0 }
  0x12   : > { %235 = vst [vmem:[#allocation2 + $0x20] sm:$0xff] (!%p878_p5), %v1119_v0  ;;  %236 = vst [vmem:[#allocation2 + $0x28] sm:$0xff] (!%p878_p5), %v1119_v0 }
  0x13   : > { %237 = vst [vmem:[#allocation2 + $0x30] sm:$0xff] (!%p878_p5), %v1119_v0  ;;  %238 = vst [vmem:[#allocation2 + $0x38] sm:$0xff] (!%p878_p5), %v1119_v0 }
  0x16 PF: > { %v1039_v1 = vld [vmem:[%s1170_s24 + $0x40] sm:$0xff]   ;;  %v1043_v5 = vld [vmem:[%s1170_s24 + $0x48] sm:$0xff]   ;;  %v1047_v9 = vld [vmem:[%s1170_s24 + $0x50] sm:$0xff]   ;;  %p927_p6 = scmp.ne.s32.totalorder %s1109_s12, 8 }
  0x17   : > { %v1040_v2 = vld [vmem:[%s1170_s24 + $0xc0] sm:$0xff]   ;;  %934 = vmatprep.subr.bf16.mxu0 %v1039_v1  ;;  %v1044_v6 = vld [vmem:[%s1170_s24 + $0xc8] sm:$0xff]   ;;  %v1048_v10 = vld [vmem:[%s1170_s24 + $0xd0] sm:$0xff]  }
  0x18   : > { %v1041_v3 = vld [vmem:[%s1170_s24] sm:$0xff]   ;;  %974 = vmatprep.subr.bf16.mxu1 %v1040_v2  ;;  %v1045_v7 = vld [vmem:[%s1170_s24 + $0x8] sm:$0xff]   ;;  %v1049_v11 = vld [vmem:[%s1170_s24 + $0x10] sm:$0xff]  }
  0x19   : > { %v1042_v4 = vld [vmem:[%s1170_s24 + $0x80] sm:$0xff]   ;;  %935 = vmatpush3.bf16.msra.mxu0 %v1041_v3  ;;  %v1046_v8 = vld [vmem:[%s1170_s24 + $0x88] sm:$0xff]   ;;  %v1050_v12 = vld [vmem:[%s1170_s24 + $0x90] sm:$0xff]  }
  0x1a   : > { %975 = vmatpush3.bf16.msra.mxu1 %v1042_v4  ;;  %936 = vmatprep.subr.bf16.mxu0 %v1043_v5  ;;  %v1051_v13 = vld [vmem:[%s1170_s24 + $0x58] sm:$0xff]   ;;  %v1055_v17 = vld [vmem:[%s1170_s24 + $0x60] sm:$0xff]   ;;  %v1059_v21 = vld [vmem:[%s1170_s24 + $0x68] sm:$0xff]  }
  0x1b   : > { %976 = vmatprep.subr.bf16.mxu1 %v1044_v6  ;;  %v1052_v14 = vld [vmem:[%s1170_s24 + $0xd8] sm:$0xff]   ;;  %v1056_v18 = vld [vmem:[%s1170_s24 + $0xe0] sm:$0xff]   ;;  %v1060_v22 = vld [vmem:[%s1170_s24 + $0xe8] sm:$0xff]  }
  0x1c   : > { %v1053_v15 = vld [vmem:[%s1170_s24 + $0x18] sm:$0xff]   ;;  %v1057_v19 = vld [vmem:[%s1170_s24 + $0x20] sm:$0xff]   ;;  %v1061_v23 = vld [vmem:[%s1170_s24 + $0x28] sm:$0xff]  }
  0x1d   : > { %937 = vmatpush3.bf16.msra.mxu0 %v1045_v7  ;;  %v1054_v16 = vld [vmem:[%s1170_s24 + $0x98] sm:$0xff]   ;;  %v1058_v20 = vld [vmem:[%s1170_s24 + $0xa0] sm:$0xff]   ;;  %v1062_v24 = vld [vmem:[%s1170_s24 + $0xa8] sm:$0xff]  }
  0x1e   : > { %977 = vmatpush3.bf16.msra.mxu1 %v1046_v8  ;;  %938 = vmatprep.subr.bf16.mxu0 %v1047_v9  ;;  %v1063_v25 = vld [vmem:[%s1170_s24 + $0x70] sm:$0xff]   ;;  %v1067_v29 = vld [vmem:[%s1170_s24 + $0x78] sm:$0xff]   ;;  %v239_v58 = vld [vmem:[#allocation2] sm:$0xff] }
  0x1f   : > { %978 = vmatprep.subr.bf16.mxu1 %v1048_v10  ;;  %v1064_v26 = vld [vmem:[%s1170_s24 + $0xf0] sm:$0xff]   ;;  %v1068_v30 = vld [vmem:[%s1170_s24 + $0xf8] sm:$0xff]   ;;  %v240_v63 = vld [vmem:[#allocation2 + $0x8] sm:$0xff] }
  0x20   : > { %v1065_v27 = vld [vmem:[%s1170_s24 + $0x30] sm:$0xff]   ;;  %v1069_v31 = vld [vmem:[%s1170_s24 + $0x38] sm:$0xff]  }
  0x21   : > { %939 = vmatpush3.bf16.msra.mxu0 %v1049_v11  ;;  %v1066_v28 = vld [vmem:[%s1170_s24 + $0xb0] sm:$0xff]   ;;  %v1070_v32 = vld [vmem:[%s1170_s24 + $0xb8] sm:$0xff]  }
  0x22   : > { %979 = vmatpush3.bf16.msra.mxu1 %v1050_v12  ;;  %940 = vmatprep.subr.bf16.mxu0 %v1051_v13  ;;  %v1071_v33 = vld [vmem:[%s1165_s21] ss:$16 sps:$4 sm:$0xff]   ;;  %v1073_v34 = vld [vmem:[%s1165_s21 + $0x4] ss:$16 sps:$4 sm:$0xff]   ;;  %v1074_v35 = vld [vmem:[%s1165_s21 + $0x8] ss:$16 sps:$4 sm:$0xff]  }
  0x23   : > { %980 = vmatprep.subr.bf16.mxu1 %v1052_v14  ;;  %v1076_v36 = vld [vmem:[%s1165_s21 + $0xc] ss:$16 sps:$4 sm:$0xff]   ;;  %631 = vmatprep.mubr.bf16.mxu0 %v1073_v34  ;;  %v1077_v37 = vld [vmem:[%s1165_s21 + $0x24] ss:$16 sps:$4 sm:$0xff]   ;;  %v1081_v39 = vld [vmem:[%s1165_s21 + $0x20] ss:$16 sps:$4 sm:$0xff]  }
  0x24   : > { %696 = vmatprep.mubr.bf16.mxu1 %v1076_v36  ;;  %v1079_v38 = vld [vmem:[%s1165_s21 + $0x2c] ss:$16 sps:$4 sm:$0xff]   ;;  %v1082_v40 = vld [vmem:[%s1165_s21 + $0x28] ss:$16 sps:$4 sm:$0xff]   ;;  %v1083_v41 = vld [vmem:[%s1165_s21 + $0x44] ss:$16 sps:$4 sm:$0xff]  }
  0x25   : > { %941 = vmatpush3.bf16.msra.mxu0 %v1053_v15  ;;  %v1085_v42 = vld [vmem:[%s1165_s21 + $0x4c] ss:$16 sps:$4 sm:$0xff]   ;;  %v1087_v43 = vld [vmem:[%s1165_s21 + $0x40] ss:$16 sps:$4 sm:$0xff]   ;;  %v1088_v44 = vld [vmem:[%s1165_s21 + $0x48] ss:$16 sps:$4 sm:$0xff]  }
  0x26   : > { %981 = vmatpush3.bf16.msra.mxu1 %v1054_v16  ;;  %942 = vmatprep.subr.bf16.mxu0 %v1055_v17  ;;  %v1089_v45 = vld [vmem:[%s1165_s21 + $0x64] ss:$16 sps:$4 sm:$0xff]   ;;  %v1091_v46 = vld [vmem:[%s1165_s21 + $0x6c] ss:$16 sps:$4 sm:$0xff]   ;;  %v1093_v47 = vld [vmem:[%s1165_s21 + $0x60] ss:$16 sps:$4 sm:$0xff]  }
  0x27   : > { %982 = vmatprep.subr.bf16.mxu1 %v1056_v18  ;;  %v1094_v48 = vld [vmem:[%s1165_s21 + $0x68] ss:$16 sps:$4 sm:$0xff]   ;;  %v241_v12 = vld [vmem:[#allocation2 + $0x10] sm:$0xff] }
  0x28   : > { %v242_v17 = vld [vmem:[#allocation2 + $0x18] sm:$0xff] }
  0x29   : > { %943 = vmatpush3.bf16.msra.mxu0 %v1057_v19 }
  0x2a   : > { %983 = vmatpush3.bf16.msra.mxu1 %v1058_v20  ;;  %944 = vmatprep.subr.bf16.mxu0 %v1059_v21 }
  0x2b   : > { %984 = vmatprep.subr.bf16.mxu1 %v1060_v22 }
  0x2d   : > { %945 = vmatpush3.bf16.msra.mxu0 %v1061_v23 }
  0x2e   : > { %985 = vmatpush3.bf16.msra.mxu1 %v1062_v24  ;;  %946 = vmatprep.subr.bf16.mxu0 %v1063_v25 }
  0x2f   : > { %986 = vmatprep.subr.bf16.mxu1 %v1064_v26 }
  0x31   : > { %947 = vmatpush3.bf16.msra.mxu0 %v1065_v27 }
  0x32   : > { %987 = vmatpush3.bf16.msra.mxu1 %v1066_v28  ;;  %948 = vmatprep.subr.bf16.mxu0 %v1067_v29 }
  0x33   : > { %988 = vmatprep.subr.bf16.mxu1 %v1068_v30  ;;  %v243_v30 = vld [vmem:[#allocation2 + $0x20] sm:$0xff] }
  0x35   : > { %949 = vmatpush3.bf16.msra.mxu0 %v1069_v31 }
  0x36   : > { %989 = vmatpush3.bf16.msra.mxu1 %v1070_v32 }
  0x38   : > { %632 = vmatmul.mubr.bf16.vlgmr.msra.gmra.mrb[0].mxu0 %v1071_v33 }
  0x39   : > { %697 = vmatmul.mubr.bf16.vlgmr.msra.gmra.mrb[0].mxu1 %v1074_v35  ;;  %639 = vmatprep.mubr.bf16.mxu0 %v1077_v37  ;;  %v244_v35 = vld [vmem:[#allocation2 + $0x28] sm:$0xff] }
  0x3a   : > { %704 = vmatprep.mubr.bf16.mxu1 %v1079_v38 }
  0x40   : > { %640 = vmatmul.mubr.bf16.gmra.mrb[4].mxu0 %v1081_v39 }
  0x41   : > { %705 = vmatmul.mubr.bf16.gmra.mrb[4].mxu1 %v1082_v40  ;;  %647 = vmatprep.mubr.bf16.mxu0 %v1083_v41 }
  0x42   : > { %712 = vmatprep.mubr.bf16.mxu1 %v1085_v42 }
  0x48   : > { %648 = vmatmul.mubr.bf16.gmra.mrb[8].mxu0 %v1087_v43 }
  0x49   : > { %713 = vmatmul.mubr.bf16.gmra.mrb[8].mxu1 %v1088_v44  ;;  %655 = vmatprep.mubr.bf16.mxu0 %v1089_v45 }
  0x4a   : > { %720 = vmatprep.mubr.bf16.mxu1 %v1091_v46 }
  0x50   : > { %656 = vmatmul.mubr.bf16.gmra.mrb[12].mxu0 %v1093_v47 }
  0x51   : > { %721 = vmatmul.mubr.bf16.gmra.mrb[12].mxu1 %v1094_v48  ;;  %v245_v48 = vld [vmem:[#allocation2 + $0x30] sm:$0xff] }
 0x10b   : > { %v950_v49 = vpop.f32.mrb[0].mxu0 }
 0x10c   : > { %v990_v50 = vpop.f32.mrb[0].mxu1  ;;  %v951_v51 = vpop.f32.mrb[1].mxu0 }
 0x10d   : > { %v952_v52 = vadd.f32 %v951_v51, %v950_v49  ;;  %v991_v53 = vpop.f32.mrb[1].mxu1  ;;  %v953_v54 = vpop.f32.mrb[2].mxu0 }
 0x10e   : > { %v992_v55 = vadd.f32 %v991_v53, %v990_v50  ;;  %v993_v56 = vpop.f32.mrb[2].mxu1  ;;  %v954_v57 = vpop.f32.mrb[3].mxu0  ;;  %v246_v53 = vld [vmem:[#allocation2 + $0x38] sm:$0xff] }
 0x10f   : > { %v955_v59 = vadd.f32 %v954_v57, %v953_v54  ;;  %v994_v60 = vpop.f32.mrb[3].mxu1 }
 0x110   : > { %v699_v61 = vadd.f32 %v992_v55, %v952_v52  ;;  %v995_v62 = vadd.f32 %v994_v60, %v993_v56 }
 0x112   : > { %v729_v0 = vadd.f32 %v699_v61, %v239_v58  ;;  %v702_v1 = vadd.f32 %v995_v62, %v955_v59  ;;  %v928_v58 = vld [vmem:[%s1260_s2] ss:$0 sm:$0xff] (!%p927_p6) }
 0x113   : > { %v956_v2 = vpop.f32.mrb[4].mxu0 }
 0x114   : > { %737 = vst [vmem:[#allocation2] sm:$0xff] %v729_v0  ;;  %v730_v3 = vadd.f32 %v702_v1, %v240_v63  ;;  %v996_v4 = vpop.f32.mrb[4].mxu1  ;;  %v957_v5 = vpop.f32.mrb[5].mxu0 }
 0x115   : > { %v958_v6 = vadd.f32 %v957_v5, %v956_v2  ;;  %v997_v7 = vpop.f32.mrb[5].mxu1  ;;  %v959_v8 = vpop.f32.mrb[6].mxu0 }
 0x116   : > { %738 = vst [vmem:[#allocation2 + $0x8] sm:$0xff] %v730_v3  ;;  %v998_v9 = vadd.f32 %v997_v7, %v996_v4  ;;  %v999_v10 = vpop.f32.mrb[6].mxu1  ;;  %v960_v11 = vpop.f32.mrb[7].mxu0 }
 0x117   : > { %v961_v13 = vadd.f32 %v960_v11, %v959_v8  ;;  %v1000_v14 = vpop.f32.mrb[7].mxu1 }
 0x118   : > { %v707_v15 = vadd.f32 %v998_v9, %v958_v6  ;;  %v1001_v16 = vadd.f32 %v1000_v14, %v999_v10 }
 0x11a   : > { %v731_v18 = vadd.f32 %v707_v15, %v241_v12  ;;  %v710_v19 = vadd.f32 %v1001_v16, %v961_v13 }
 0x11b   : > { %v962_v20 = vpop.f32.mrb[8].mxu0  ;;  %v749_v57 = vld [vmem:[#allocation2] sm:$0xff] (!%p927_p6) }
 0x11c   : > { %739 = vst [vmem:[#allocation2 + $0x10] sm:$0xff] %v731_v18  ;;  %v732_v21 = vadd.f32 %v710_v19, %v242_v17  ;;  %v1002_v22 = vpop.f32.mrb[8].mxu1  ;;  %v963_v23 = vpop.f32.mrb[9].mxu0  ;;  %v764_v60 = vadd.f32 (!%p927_p6), %v928_v58, %v749_v57 }
 0x11d   : > { %v964_v24 = vadd.f32 %v963_v23, %v962_v20  ;;  %v1003_v25 = vpop.f32.mrb[9].mxu1  ;;  %v965_v26 = vpop.f32.mrb[10].mxu0  ;;  %v750_v59 = vld [vmem:[#allocation2 + $0x8] sm:$0xff] (!%p927_p6) }
 0x11e   : > { %740 = vst [vmem:[#allocation2 + $0x18] sm:$0xff] %v732_v21  ;;  %v1004_v27 = vadd.f32 %v1003_v25, %v1002_v22  ;;  %v1005_v28 = vpop.f32.mrb[10].mxu1  ;;  %v966_v29 = vpop.f32.mrb[11].mxu0  ;;  %v765_v61 = vadd.f32 (!%p927_p6), %v928_v58, %v750_v59  ;;  %772 = vst [vmem:[%s1261_s3] sm:$0xff] (!%p927_p6), %v764_v60 }
 0x11f   : > { %v967_v31 = vadd.f32 %v966_v29, %v965_v26  ;;  %v1006_v32 = vpop.f32.mrb[11].mxu1 }
 0x120   : > { %v715_v33 = vadd.f32 %v1004_v27, %v964_v24  ;;  %v1007_v34 = vadd.f32 %v1006_v32, %v1005_v28  ;;  %773 = vst [vmem:[%s1261_s3 + $0x8] sm:$0xff] (!%p927_p6), %v765_v61 }
 0x122   : > { %v733_v36 = vadd.f32 %v715_v33, %v243_v30  ;;  %v718_v37 = vadd.f32 %v1007_v34, %v967_v31 }
 0x123   : > { %v968_v38 = vpop.f32.mrb[12].mxu0  ;;  %v751_v62 = vld [vmem:[#allocation2 + $0x10] sm:$0xff] (!%p927_p6) }
 0x124   : > { %741 = vst [vmem:[#allocation2 + $0x20] sm:$0xff] %v733_v36  ;;  %v734_v39 = vadd.f32 %v718_v37, %v244_v35  ;;  %v1008_v40 = vpop.f32.mrb[12].mxu1  ;;  %v969_v41 = vpop.f32.mrb[13].mxu0  ;;  %v766_v1 = vadd.f32 (!%p927_p6), %v928_v58, %v751_v62 }
 0x125   : > { %v970_v42 = vadd.f32 %v969_v41, %v968_v38  ;;  %v1009_v43 = vpop.f32.mrb[13].mxu1  ;;  %v971_v44 = vpop.f32.mrb[14].mxu0  ;;  %v752_v63 = vld [vmem:[#allocation2 + $0x18] sm:$0xff] (!%p927_p6) }
 0x126   : > { %742 = vst [vmem:[#allocation2 + $0x28] sm:$0xff] %v734_v39  ;;  %v1010_v45 = vadd.f32 %v1009_v43, %v1008_v40  ;;  %v1011_v46 = vpop.f32.mrb[14].mxu1  ;;  %v972_v47 = vpop.f32.mrb[15].mxu0  ;;  %v767_v2 = vadd.f32 (!%p927_p6), %v928_v58, %v752_v63  ;;  %774 = vst [vmem:[%s1261_s3 + $0x10] sm:$0xff] (!%p927_p6), %v766_v1 }
 0x127   : > { %v973_v49 = vadd.f32 %v972_v47, %v971_v44  ;;  %v1012_v50 = vpop.f32.mrb[15].mxu1 }
 0x128   : > { %v723_v51 = vadd.f32 %v1010_v45, %v970_v42  ;;  %v1013_v52 = vadd.f32 %v1012_v50, %v1011_v46  ;;  %748 = sbr.rel (%p927_p6) target bundleno = 313 (0x139), region = 40  ;;  %775 = vst [vmem:[%s1261_s3 + $0x18] sm:$0xff] (!%p927_p6), %v767_v2 }
 0x12a   : > { %v735_v54 = vadd.f32 %v723_v51, %v245_v48  ;;  %v726_v55 = vadd.f32 %v1013_v52, %v973_v49 }
 0x12b   : > { %v753_v0 = vld [vmem:[#allocation2 + $0x20] sm:$0xff] (!%p927_p6) }
 0x12c   : > { %743 = vst [vmem:[#allocation2 + $0x30] sm:$0xff] %v735_v54  ;;  %v736_v56 = vadd.f32 %v726_v55, %v246_v53  ;;  %v768_v3 = vadd.f32 (!%p927_p6), %v928_v58, %v753_v0 }
 0x12d   : > { %v754_v4 = vld [vmem:[#allocation2 + $0x28] sm:$0xff] (!%p927_p6) }
 0x12e   : > { %744 = vst [vmem:[#allocation2 + $0x38] sm:$0xff] %v736_v56  ;;  %v769_v7 = vadd.f32 (!%p927_p6), %v928_v58, %v754_v4  ;;  %776 = vst [vmem:[%s1261_s3 + $0x20] sm:$0xff] (!%p927_p6), %v768_v3 }
 0x130   : > { %777 = vst [vmem:[%s1261_s3 + $0x28] sm:$0xff] %v769_v7 }
 0x133   : > { %v755_v5 = vld [vmem:[#allocation2 + $0x30] sm:$0xff] }
 0x134   : > { %v770_v8 = vadd.f32 %v928_v58, %v755_v5 }
 0x135   : > { %v756_v6 = vld [vmem:[#allocation2 + $0x38] sm:$0xff] }
 0x136   : > { %v771_v9 = vadd.f32 %v928_v58, %v756_v6  ;;  %778 = vst [vmem:[%s1261_s3 + $0x30] sm:$0xff] %v770_v8 }
 0x138   : > { %779 = vst [vmem:[%s1261_s3 + $0x38] sm:$0xff] %v771_v9 }
 0x139 PF: > { %s13_s14 = sadd.s32 1, %s1117_s14   ;;  %s1262_s12 = smov %s1113_s13 }
 0x13a   : > { %p10_p7 = scmp.ge.s32.totalorder %s13_s14, 11   ;;  %s1263_s13 = smov %s1265_s15 }
 0x13c   :  { %12 = sbr.rel (!%p10_p7) target bundleno = 2 (0x2), region = 76 }

// kernel: squeeze.11
= control target key start
LH: loop header
LB: loop body
LE: loop exit
PB: predicated region body
PF: predicated region fallthrough
CT: control target
= control target key end

     0   :  { %vm9_vm0 = vcmask 15360   ;;  %vm36_vm1 = vcmask 48128   ;;  %vm22_vm2 = vcmask 31744   ;;  %vm50_vm3 = vcmask 64512   ;;  %s643_s18 = smov 126   ;;  %s644_s23 = smov 122   ;;  %s1126_s0 = inlined_call_operand.vmem [shape: f32[8,8,1,9], index: 0, kind: input, shape index: {}]   ;;  %s1127_s1 = inlined_call_operand.vmem [shape: f32[576], index: 1, kind: output, shape index: {}]  }
   0x1   :  { %v460_v0 = vld [vmem:[%s1126_s0 + $0xe] sm:$0x1]   ;;  %v467_v2 = vld [vmem:[%s1126_s0 + $0x2a] sm:$0x1]   ;;  %v463_v5 = vld [vmem:[%s1126_s0 + $0x1c] sm:$0x1]  }
   0x2   :  { %v461_v1 = vld [vmem:[%s1126_s0 + $0xe] sm:$0x1]   ;;  %v468_v4 = vld [vmem:[%s1126_s0 + $0x2a] sm:$0x1]   ;;  %v464_v6 = vld [vmem:[%s1126_s0 + $0x1c] sm:$0x1]  }
   0x3   :  { %v10_v3 = vsel %vm9_vm0, %v461_v1, %v460_v0  ;;  %v37_v7 = vsel %vm36_vm1, %v468_v4, %v467_v2  ;;  %v471_v8 = vld [vmem:[%s1126_s0 + $0x38] sm:$0x1]   ;;  %v23_v10 = vsel %vm22_vm2, %v464_v6, %v463_v5  ;;  %s645_s24 = smov 124   ;;  %s646_s25 = smov 120   ;;  %v475_v12 = vld [vmem:[%s1126_s0 + $0xd] sm:$0x1]  }
   0x4   :  { %11 = vrot.lane.b32.xlu0 %v10_v3, %s643_s18  ;;  %v472_v9 = vld [vmem:[%s1126_s0 + $0x38] sm:$0x1]   ;;  %38 = vrot.lane.b32.xlu1 %v37_v7, %s644_s23  ;;  %v476_v13 = vld [vmem:[%s1126_s0 + $0x1b] sm:$0x1]   ;;  %s647_s30 = smov 117   ;;  %s648_s2 = smov 115  }
   0x5   :  { %v51_v11 = vsel %vm50_vm3, %v472_v9, %v471_v8  ;;  %v478_v14 = vld [vmem:[%s1126_s0 + $0x29] sm:$0x1]   ;;  %v480_v15 = vld [vmem:[%s1126_s0 + $0x37] sm:$0x1]   ;;  %s649_s7 = smov 113   ;;  %s650_s8 = smov 111  }
   0x6   :  { %v482_v16 = vld [vmem:[%s1126_s0 + $0xc] sm:$0x1]   ;;  %v483_v17 = vld [vmem:[%s1126_s0 + $0x1a] sm:$0x1]   ;;  %s651_s13 = smov 108   ;;  %s652_s14 = smov 106  }
   0x7   :  { %v485_v18 = vld [vmem:[%s1126_s0 + $0x28] sm:$0x1]   ;;  %v487_v19 = vld [vmem:[%s1126_s0 + $0x36] sm:$0x1]   ;;  %s653_s19 = smov 104   ;;  %s654_s20 = smov 102  }
   0x8   :  { %24 = vrot.lane.b32.xlu0 %v23_v10, %s645_s24  ;;  %52 = vrot.lane.b32.xlu1 %v51_v11, %s646_s25  ;;  %v489_v20 = vld [vmem:[%s1126_s0 + $0xb] sm:$0x1]   ;;  %v490_v21 = vld [vmem:[%s1126_s0 + $0x19] sm:$0x1]   ;;  %s655_s25 = smov 99   ;;  %s656_s26 = smov 97  }
   0x9   :  { %v492_v22 = vld [vmem:[%s1126_s0 + $0x27] sm:$0x1]   ;;  %v494_v23 = vld [vmem:[%s1126_s0 + $0x35] sm:$0x1]   ;;  %vm3_vm4 = vcmask 72704   ;;  %s658_s5 = smov 93  }
   0xa   :  { %v2_v24 = vld [vmem:[%s1126_s0] sm:$0x1]   ;;  %v496_v25 = vld [vmem:[%s1126_s0 + $0xa] sm:$0x1]   ;;  %v497_v26 = vld [vmem:[%s1126_s0 + $0x18] sm:$0x1]  }
   0xb   :  { %4 = vst.msk [vmem:[%s1127_s1] sm:$0x1] %vm3_vm4, %v2_v24   ;;  %s659_s12 = smov 90   ;;  %v499_v27 = vld [vmem:[%s1126_s0 + $0x26] sm:$0x1]   ;;  %s661_s18 = smov 86  }
   0xc   :  { %62 = vrot.lane.b32.xlu0 %v475_v12, %s647_s30  ;;  %68 = vrot.lane.b32.xlu1 %v476_v13, %s648_s2  ;;  %s657_s2 = smov 95   ;;  %v501_v28 = vld [vmem:[%s1126_s0 + $0x34] sm:$0x1]   ;;  %v503_v29 = vld [vmem:[%s1126_s0 + $0x9] sm:$0x1]   ;;  %s663_s24 = smov 81  }
   0xd   :  { %v504_v30 = vld [vmem:[%s1126_s0 + $0x17] sm:$0x1]   ;;  %v506_v31 = vld [vmem:[%s1126_s0 + $0x25] sm:$0x1]   ;;  %v508_v32 = vld [vmem:[%s1126_s0 + $0x33] sm:$0x1]  }
   0xe   :  { %s665_s30 = smov 77   ;;  %v510_v33 = vld [vmem:[%s1126_s0 + $0x8] sm:$0x1]   ;;  %v511_v34 = vld [vmem:[%s1126_s0 + $0x16] sm:$0x1]   ;;  %s676_s3 = smov 54  }
   0xf   :  { %v513_v35 = vld [vmem:[%s1126_s0 + $0x24] sm:$0x1]   ;;  %v515_v36 = vld [vmem:[%s1126_s0 + $0x32] sm:$0x1]   ;;  %v517_v37 = vld [vmem:[%s1126_s0 + $0x7] sm:$0x1]  }
  0x10   :  { %75 = vrot.lane.b32.xlu0 %v478_v14, %s649_s7  ;;  %82 = vrot.lane.b32.xlu1 %v480_v15, %s650_s8  ;;  %s667_s7 = smov 72   ;;  %s668_s8 = smov 70   ;;  %v518_v38 = vld [vmem:[%s1126_s0 + $0x15] sm:$0x1]   ;;  %v520_v39 = vld [vmem:[%s1126_s0 + $0x23] sm:$0x1]  }
  0x11   :  { %v522_v40 = vld [vmem:[%s1126_s0 + $0x31] sm:$0x1]   ;;  %v524_v41 = vld [vmem:[%s1126_s0 + $0x3f] sm:$0x1]   ;;  %v526_v42 = vld [vmem:[%s1126_s0 + $0x6] sm:$0x1]  }
  0x12   :  { %v527_v43 = vld [vmem:[%s1126_s0 + $0x14] sm:$0x1]   ;;  %v529_v44 = vld [vmem:[%s1126_s0 + $0x22] sm:$0x1]   ;;  %s678_s9 = smov 50   ;;  %s680_s15 = smov 46  }
  0x13   :  { %v531_v45 = vld [vmem:[%s1126_s0 + $0x30] sm:$0x1]   ;;  %v533_v46 = vld [vmem:[%s1126_s0 + $0x3e] sm:$0x1]   ;;  %v535_v47 = vld [vmem:[%s1126_s0 + $0x5] sm:$0x1]  }
  0x14   :  { %89 = vrot.lane.b32.xlu0 %v482_v16, %s651_s13  ;;  %95 = vrot.lane.b32.xlu1 %v483_v17, %s652_s14  ;;  %s660_s13 = smov 88   ;;  %s670_s14 = smov 66   ;;  %v536_v48 = vld [vmem:[%s1126_s0 + $0x13] sm:$0x1]   ;;  %v538_v49 = vld [vmem:[%s1126_s0 + $0x21] sm:$0x1]  }
  0x15   :  { %s682_s21 = smov 43   ;;  %v540_v50 = vld [vmem:[%s1126_s0 + $0x2f] sm:$0x1]   ;;  %s684_s27 = smov 39   ;;  %v542_v51 = vld [vmem:[%s1126_s0 + $0x3d] sm:$0x1]  }
  0x16   :  { %v544_v52 = vld [vmem:[%s1126_s0 + $0x4] sm:$0x1]   ;;  %s686_s4 = smov 36   ;;  %v545_v53 = vld [vmem:[%s1126_s0 + $0x12] sm:$0x1]   ;;  %s688_s10 = smov 32  }
  0x17   :  { %v547_v54 = vld [vmem:[%s1126_s0 + $0x20] sm:$0x1]   ;;  %v549_v55 = vld [vmem:[%s1126_s0 + $0x2e] sm:$0x1]   ;;  %v551_v56 = vld [vmem:[%s1126_s0 + $0x3c] sm:$0x1]  }
  0x18   :  { %102 = vrot.lane.b32.xlu0 %v485_v18, %s653_s19  ;;  %109 = vrot.lane.b32.xlu1 %v487_v19, %s654_s20  ;;  %s662_s19 = smov 84   ;;  %s672_s20 = smov 61   ;;  %v553_v57 = vld [vmem:[%s1126_s0 + $0x3] sm:$0x1]   ;;  %v554_v58 = vld [vmem:[%s1126_s0 + $0x11] sm:$0x1]  }
  0x19   :  { %s690_s16 = smov 28   ;;  %s692_s22 = smov 25   ;;  %v556_v59 = vld [vmem:[%s1126_s0 + $0x1f] sm:$0x1]   ;;  %v558_v60 = vld [vmem:[%s1126_s0 + $0x2d] sm:$0x1]  }
  0x1a   :  { %s694_s28 = smov 21   ;;  %v560_v61 = vld [vmem:[%s1126_s0 + $0x3b] sm:$0x1]   ;;  %v562_v62 = vld [vmem:[%s1126_s0 + $0x2] sm:$0x1]   ;;  %s698_s11 = smov 14  }
  0x1b   :  { %v563_v63 = vld [vmem:[%s1126_s0 + $0x10] sm:$0x1]   ;;  %v565_v0 = vld [vmem:[%s1126_s0 + $0x1e] sm:$0x1]   ;;  %v567_v1 = vld [vmem:[%s1126_s0 + $0x2c] sm:$0x1]  }
  0x1c   :  { %116 = vrot.lane.b32.xlu0 %v489_v20, %s655_s25  ;;  %122 = vrot.lane.b32.xlu1 %v490_v21, %s656_s26  ;;  %s664_s25 = smov 79   ;;  %s674_s26 = smov 57   ;;  %v569_v2 = vld [vmem:[%s1126_s0 + $0x3a] sm:$0x1]   ;;  %vm13_vm5 = vcmask 56320   ;;  %vm16_vm6 = vcmask 1048560  }
  0x1d   :  { %s700_s17 = smov 10   ;;  %v571_v3 = vld [vmem:[%s1126_s0 + $0x1] sm:$0x1]   ;;  %vm40_vm7 = vcmask 23552   ;;  %v572_v5 = vld [vmem:[%s1126_s0 + $0xf] sm:$0x1]  }
  0x1e   :  { %vm26_vm8 = vcmask 39936   ;;  %vm29_vm9 = vcmask 1048544   ;;  %vm43_vm10 = vcmask 1048528   ;;  %s702_s29 = smov 7   ;;  %v574_v7 = vld [vmem:[%s1126_s0 + $0x1d] sm:$0x1]  }
  0x1f   :  { %vm54_vm11 = vcmask 7168   ;;  %vm57_vm12 = vcmask 1048512   ;;  %v576_v9 = vld [vmem:[%s1126_s0 + $0x2b] sm:$0x1]   ;;  %vm64_vm13 = vcmask 1032104   ;;  %vm70_vm14 = vcmask 1015704  }
  0x20   :  { %129 = vrot.lane.b32.xlu0 %v492_v22, %s657_s2  ;;  %136 = vrot.lane.b32.xlu1 %v494_v23, %s658_s5  ;;  %s666_s2 = smov 75   ;;  %s696_s5 = smov 18   ;;  %v578_v11 = vld [vmem:[%s1126_s0 + $0x39] sm:$0x1]   ;;  %vm77_vm15 = vcmask 999304   ;;  %vm84_vm0 = vcmask 982904  }
  0x21   :  { %vm91_vm1 = vcmask 958304   ;;  %vm97_vm2 = vcmask 941904   ;;  %vm104_vm3 = vcmask 925504   ;;  %vm111_vm4 = vcmask 909104  }
  0x24   :  { %143 = vrot.lane.b32.xlu0 %v496_v25, %s659_s12  ;;  %149 = vrot.lane.b32.xlu1 %v497_v26, %s660_s13  ;;  %s669_s13 = smov 68  }
  0x28   :  { %156 = vrot.lane.b32.xlu0 %v499_v27, %s661_s18  ;;  %163 = vrot.lane.b32.xlu1 %v501_v28, %s662_s19  ;;  %s671_s19 = smov 63  }
  0x2c   :  { %170 = vrot.lane.b32.xlu0 %v503_v29, %s663_s24  ;;  %176 = vrot.lane.b32.xlu1 %v504_v30, %s664_s25  ;;  %s673_s25 = smov 59  }
  0x30   :  { %183 = vrot.lane.b32.xlu0 %v506_v31, %s665_s30  ;;  %190 = vrot.lane.b32.xlu1 %v508_v32, %s666_s2  ;;  %s675_s2 = smov 55  }
  0x34   :  { %197 = vrot.lane.b32.xlu0 %v510_v33, %s667_s7  ;;  %203 = vrot.lane.b32.xlu1 %v511_v34, %s668_s8  ;;  %s677_s8 = smov 52  }
  0x38   :  { %210 = vrot.lane.b32.xlu0 %v513_v35, %s669_s13  ;;  %217 = vrot.lane.b32.xlu1 %v515_v36, %s670_s14  ;;  %s679_s14 = smov 48  }
  0x3c   :  { %224 = vrot.lane.b32.xlu0 %v517_v37, %s671_s19  ;;  %230 = vrot.lane.b32.xlu1 %v518_v38, %s672_s20  ;;  %s681_s20 = smov 45  }
  0x40   :  { %237 = vrot.lane.b32.xlu0 %v520_v39, %s673_s25  ;;  %244 = vrot.lane.b32.xlu1 %v522_v40, %s674_s26  ;;  %s683_s26 = smov 41  }
  0x44   :  { %251 = vrot.lane.b32.xlu0 %v524_v41, %s675_s2  ;;  %258 = vrot.lane.b32.xlu1 %v526_v42, %s676_s3  ;;  %s685_s3 = smov 37  }
  0x48   :  { %264 = vrot.lane.b32.xlu0 %v527_v43, %s677_s8  ;;  %271 = vrot.lane.b32.xlu1 %v529_v44, %s678_s9  ;;  %s687_s9 = smov 34  }
  0x4c   :  { %278 = vrot.lane.b32.xlu0 %v531_v45, %s679_s14  ;;  %285 = vrot.lane.b32.xlu1 %v533_v46, %s680_s15  ;;  %s689_s15 = smov 30  }
  0x50   :  { %292 = vrot.lane.b32.xlu0 %v535_v47, %s681_s20  ;;  %298 = vrot.lane.b32.xlu1 %v536_v48, %s682_s21  ;;  %s691_s21 = smov 27   ;;  %s705_s20 = smov 1  }
  0x54   :  { %305 = vrot.lane.b32.xlu0 %v538_v49, %s683_s26  ;;  %312 = vrot.lane.b32.xlu1 %v540_v50, %s684_s27  ;;  %s693_s27 = smov 23   ;;  %s701_s26 = smov 9  }
  0x58   :  { %319 = vrot.lane.b32.xlu0 %v542_v51, %s685_s3  ;;  %326 = vrot.lane.b32.xlu1 %v544_v52, %s686_s4  ;;  %s695_s4 = smov 19  }
  0x5c   :  { %332 = vrot.lane.b32.xlu0 %v545_v53, %s687_s9  ;;  %339 = vrot.lane.b32.xlu1 %v547_v54, %s688_s10  ;;  %s697_s10 = smov 16  }
  0x60   :  { %346 = vrot.lane.b32.xlu0 %v549_v55, %s689_s15  ;;  %353 = vrot.lane.b32.xlu1 %v551_v56, %s690_s16  ;;  %s699_s16 = smov 12  }
  0x64   :  { %360 = vrot.lane.b32.xlu0 %v553_v57, %s691_s21  ;;  %366 = vrot.lane.b32.xlu1 %v554_v58, %s692_s22 }
  0x68   :  { %373 = vrot.lane.b32.xlu0 %v556_v59, %s693_s27  ;;  %380 = vrot.lane.b32.xlu1 %v558_v60, %s694_s28 }
  0x6c   :  { %387 = vrot.lane.b32.xlu0 %v560_v61, %s695_s4  ;;  %394 = vrot.lane.b32.xlu1 %v562_v62, %s696_s5 }
  0x70   :  { %400 = vrot.lane.b32.xlu0 %v563_v63, %s697_s10  ;;  %407 = vrot.lane.b32.xlu1 %v565_v0, %s698_s11  ;;  %s703_s11 = smov 5  }
  0x74   :  { %414 = vrot.lane.b32.xlu0 %v567_v1, %s699_s16  ;;  %421 = vrot.lane.b32.xlu1 %v569_v2, %s700_s17  ;;  %s704_s16 = smov 3  }
  0x76   :  { %v12_v4 = vpop.permute.xlu0 %11   ;;  %v39_v6 = vpop.permute.xlu1 %38  }
  0x77   :  { %462 = vst.msk [vmem:[%s1127_s1 + $0x1] sm:$0x1] %vm13_vm5, %v12_v4   ;;  %vm118_vm5 = vcmask 884504  }
  0x78   :  { %17 = vst.msk [vmem:[%s1127_s1] sm:$0x1] %vm16_vm6, %v12_v4   ;;  %428 = vrot.lane.b32.xlu0 %v571_v3, %s701_s26  ;;  %434 = vrot.lane.b32.xlu1 %v572_v5, %s702_s29  ;;  %vm124_vm6 = vcmask 868104  }
  0x79   :  { %469 = vst.msk [vmem:[%s1127_s1 + $0x3] sm:$0x1] %vm40_vm7, %v39_v6   ;;  %vm131_vm7 = vcmask 851704  }
  0x7a   :  { %v25_v8 = vpop.permute.xlu0 %24   ;;  %v53_v10 = vpop.permute.xlu1 %52  }
  0x7b   :  { %465 = vst.msk [vmem:[%s1127_s1 + $0x2] sm:$0x1] %vm26_vm8, %v25_v8   ;;  %vm138_vm8 = vcmask 835304  }
  0x7c   :  { %466 = vst.msk [vmem:[%s1127_s1 + $0x1] sm:$0x1] %vm29_vm9, %v25_v8   ;;  %441 = vrot.lane.b32.xlu0 %v574_v7, %s703_s11  ;;  %448 = vrot.lane.b32.xlu1 %v576_v9, %s704_s16  ;;  %vm145_vm9 = vcmask 810704  }
  0x7d   :  { %470 = vst.msk [vmem:[%s1127_s1 + $0x2] sm:$0x1] %vm43_vm10, %v39_v6   ;;  %vm151_vm10 = vcmask 794304  }
  0x7e   :  { %473 = vst.msk [vmem:[%s1127_s1 + $0x4] sm:$0x1] %vm54_vm11, %v53_v10   ;;  %v63_v12 = vpop.permute.xlu0 %62   ;;  %v69_v13 = vpop.permute.xlu1 %68   ;;  %vm158_vm11 = vcmask 777904  }
  0x7f   :  { %474 = vst.msk [vmem:[%s1127_s1 + $0x3] sm:$0x1] %vm57_vm12, %v53_v10   ;;  %vm165_vm12 = vcmask 761504  }
  0x80   :  { %65 = vst.msk [vmem:[%s1127_s1] sm:$0x1] %vm64_vm13, %v63_v12   ;;  %455 = vrot.lane.b32.xlu0 %v578_v11, %s705_s20  ;;  %vm172_vm13 = vcmask 736904  }
  0x81   :  { %477 = vst.msk [vmem:[%s1127_s1 + $0x1] sm:$0x1] %vm70_vm14, %v69_v13   ;;  %vm178_vm14 = vcmask 720504  }
  0x82   :  { %v76_v14 = vpop.permute.xlu0 %75   ;;  %v83_v15 = vpop.permute.xlu1 %82  }
  0x83   :  { %479 = vst.msk [vmem:[%s1127_s1 + $0x2] sm:$0x1] %vm77_vm15, %v76_v14   ;;  %vm185_vm15 = vcmask 704104  }
  0x84   :  { %481 = vst.msk [vmem:[%s1127_s1 + $0x3] sm:$0x1] %vm84_vm0, %v83_v15   ;;  %vm192_vm0 = vcmask 687704  }
  0x86   :  { %v90_v16 = vpop.permute.xlu0 %89   ;;  %v96_v17 = vpop.permute.xlu1 %95  }
  0x87   :  { %92 = vst.msk [vmem:[%s1127_s1] sm:$0x1] %vm91_vm1, %v90_v16   ;;  %vm199_vm1 = vcmask 663104  }
  0x88   :  { %484 = vst.msk [vmem:[%s1127_s1 + $0x1] sm:$0x1] %vm97_vm2, %v96_v17   ;;  %vm205_vm2 = vcmask 646704  }
  0x8a   :  { %v103_v18 = vpop.permute.xlu0 %102   ;;  %v110_v19 = vpop.permute.xlu1 %109  }
  0x8b   :  { %486 = vst.msk [vmem:[%s1127_s1 + $0x2] sm:$0x1] %vm104_vm3, %v103_v18   ;;  %vm212_vm3 = vcmask 630304  }
  0x8c   :  { %488 = vst.msk [vmem:[%s1127_s1 + $0x3] sm:$0x1] %vm111_vm4, %v110_v19   ;;  %vm219_vm4 = vcmask 613904  }
  0x8e   :  { %v117_v20 = vpop.permute.xlu0 %116   ;;  %v123_v21 = vpop.permute.xlu1 %122  }
  0x8f   :  { %119 = vst.msk [vmem:[%s1127_s1] sm:$0x1] %vm118_vm5, %v117_v20   ;;  %vm226_vm5 = vcmask 589304  }
  0x90   :  { %491 = vst.msk [vmem:[%s1127_s1 + $0x1] sm:$0x1] %vm124_vm6, %v123_v21   ;;  %vm232_vm6 = vcmask 572904  }
  0x92   :  { %v130_v22 = vpop.permute.xlu0 %129   ;;  %v137_v23 = vpop.permute.xlu1 %136  }
  0x93   :  { %493 = vst.msk [vmem:[%s1127_s1 + $0x2] sm:$0x1] %vm131_vm7, %v130_v22   ;;  %vm239_vm7 = vcmask 556504  }
  0x94   :  { %495 = vst.msk [vmem:[%s1127_s1 + $0x3] sm:$0x1] %vm138_vm8, %v137_v23   ;;  %vm246_vm8 = vcmask 540104  }
  0x96   :  { %v144_v24 = vpop.permute.xlu0 %143   ;;  %v150_v25 = vpop.permute.xlu1 %149  }
  0x97   :  { %146 = vst.msk [vmem:[%s1127_s1] sm:$0x1] %vm145_vm9, %v144_v24   ;;  %vm253_vm9 = vcmask 523704  }
  0x98   :  { %498 = vst.msk [vmem:[%s1127_s1 + $0x1] sm:$0x1] %vm151_vm10, %v150_v25   ;;  %vm260_vm10 = vcmask 515504  }
  0x9a   :  { %v157_v26 = vpop.permute.xlu0 %156   ;;  %v164_v27 = vpop.permute.xlu1 %163  }
  0x9b   :  { %500 = vst.msk [vmem:[%s1127_s1 + $0x2] sm:$0x1] %vm158_vm11, %v157_v26   ;;  %vm266_vm11 = vcmask 499104  }
  0x9c   :  { %502 = vst.msk [vmem:[%s1127_s1 + $0x3] sm:$0x1] %vm165_vm12, %v164_v27   ;;  %vm273_vm12 = vcmask 482704  }
  0x9e   :  { %v171_v28 = vpop.permute.xlu0 %170   ;;  %v177_v29 = vpop.permute.xlu1 %176  }
  0x9f   :  { %173 = vst.msk [vmem:[%s1127_s1] sm:$0x1] %vm172_vm13, %v171_v28   ;;  %vm280_vm13 = vcmask 466304  }
  0xa0   :  { %505 = vst.msk [vmem:[%s1127_s1 + $0x1] sm:$0x1] %vm178_vm14, %v177_v29   ;;  %vm287_vm14 = vcmask 449904  }
  0xa2   :  { %v184_v30 = vpop.permute.xlu0 %183   ;;  %v191_v31 = vpop.permute.xlu1 %190  }
  0xa3   :  { %507 = vst.msk [vmem:[%s1127_s1 + $0x2] sm:$0x1] %vm185_vm15, %v184_v30   ;;  %vm294_vm15 = vcmask 441704  }
  0xa4   :  { %509 = vst.msk [vmem:[%s1127_s1 + $0x3] sm:$0x1] %vm192_vm0, %v191_v31   ;;  %vm300_vm0 = vcmask 425304  }
  0xa6   :  { %v198_v32 = vpop.permute.xlu0 %197   ;;  %v204_v33 = vpop.permute.xlu1 %203  }
  0xa7   :  { %200 = vst.msk [vmem:[%s1127_s1] sm:$0x1] %vm199_vm1, %v198_v32   ;;  %vm307_vm1 = vcmask 408904  }
  0xa8   :  { %512 = vst.msk [vmem:[%s1127_s1 + $0x1] sm:$0x1] %vm205_vm2, %v204_v33   ;;  %vm314_vm2 = vcmask 392504  }
  0xaa   :  { %v211_v34 = vpop.permute.xlu0 %210   ;;  %v218_v35 = vpop.permute.xlu1 %217  }
  0xab   :  { %514 = vst.msk [vmem:[%s1127_s1 + $0x2] sm:$0x1] %vm212_vm3, %v211_v34   ;;  %vm321_vm3 = vcmask 376104  }
  0xac   :  { %516 = vst.msk [vmem:[%s1127_s1 + $0x3] sm:$0x1] %vm219_vm4, %v218_v35   ;;  %vm328_vm4 = vcmask 367904  }
  0xae   :  { %v225_v36 = vpop.permute.xlu0 %224   ;;  %v231_v37 = vpop.permute.xlu1 %230  }
  0xaf   :  { %227 = vst.msk [vmem:[%s1127_s1] sm:$0x1] %vm226_vm5, %v225_v36   ;;  %vm334_vm5 = vcmask 351504  }
  0xb0   :  { %519 = vst.msk [vmem:[%s1127_s1 + $0x1] sm:$0x1] %vm232_vm6, %v231_v37   ;;  %vm341_vm6 = vcmask 335104  }
  0xb2   :  { %v238_v38 = vpop.permute.xlu0 %237   ;;  %v245_v39 = vpop.permute.xlu1 %244  }
  0xb3   :  { %521 = vst.msk [vmem:[%s1127_s1 + $0x2] sm:$0x1] %vm239_vm7, %v238_v38   ;;  %vm348_vm7 = vcmask 318704  }
  0xb4   :  { %523 = vst.msk [vmem:[%s1127_s1 + $0x3] sm:$0x1] %vm246_vm8, %v245_v39   ;;  %vm355_vm8 = vcmask 302304  }
  0xb6   :  { %v252_v40 = vpop.permute.xlu0 %251   ;;  %v259_v41 = vpop.permute.xlu1 %258  }
  0xb7   :  { %525 = vst.msk [vmem:[%s1127_s1 + $0x4] sm:$0x1] %vm253_vm9, %v252_v40   ;;  %vm362_vm9 = vcmask 294104  }
  0xb8   :  { %261 = vst.msk [vmem:[%s1127_s1] sm:$0x1] %vm260_vm10, %v259_v41   ;;  %vm368_vm10 = vcmask 277704  }
  0xba   :  { %v265_v42 = vpop.permute.xlu0 %264   ;;  %v272_v43 = vpop.permute.xlu1 %271  }
  0xbb   :  { %528 = vst.msk [vmem:[%s1127_s1 + $0x1] sm:$0x1] %vm266_vm11, %v265_v42   ;;  %vm375_vm11 = vcmask 261304  }
  0xbc   :  { %530 = vst.msk [vmem:[%s1127_s1 + $0x2] sm:$0x1] %vm273_vm12, %v272_v43   ;;  %vm382_vm12 = vcmask 244904  }
  0xbe   :  { %v279_v44 = vpop.permute.xlu0 %278   ;;  %v286_v45 = vpop.permute.xlu1 %285  }
  0xbf   :  { %532 = vst.msk [vmem:[%s1127_s1 + $0x3] sm:$0x1] %vm280_vm13, %v279_v44   ;;  %vm389_vm13 = vcmask 228504  }
  0xc0   :  { %534 = vst.msk [vmem:[%s1127_s1 + $0x4] sm:$0x1] %vm287_vm14, %v286_v45   ;;  %vm396_vm14 = vcmask 220304  }
  0xc2   :  { %v293_v46 = vpop.permute.xlu0 %292   ;;  %v299_v47 = vpop.permute.xlu1 %298  }
  0xc3   :  { %295 = vst.msk [vmem:[%s1127_s1] sm:$0x1] %vm294_vm15, %v293_v46   ;;  %vm402_vm15 = vcmask 203904  }
  0xc4   :  { %537 = vst.msk [vmem:[%s1127_s1 + $0x1] sm:$0x1] %vm300_vm0, %v299_v47   ;;  %vm409_vm0 = vcmask 187504  }
  0xc6   :  { %v306_v48 = vpop.permute.xlu0 %305   ;;  %v313_v49 = vpop.permute.xlu1 %312  }
  0xc7   :  { %539 = vst.msk [vmem:[%s1127_s1 + $0x2] sm:$0x1] %vm307_vm1, %v306_v48   ;;  %vm416_vm1 = vcmask 171104  }
  0xc8   :  { %541 = vst.msk [vmem:[%s1127_s1 + $0x3] sm:$0x1] %vm314_vm2, %v313_v49   ;;  %vm423_vm2 = vcmask 154704  }
  0xca   :  { %v320_v50 = vpop.permute.xlu0 %319   ;;  %v327_v51 = vpop.permute.xlu1 %326  }
  0xcb   :  { %543 = vst.msk [vmem:[%s1127_s1 + $0x4] sm:$0x1] %vm321_vm3, %v320_v50   ;;  %vm430_vm3 = vcmask 146504  }
  0xcc   :  { %329 = vst.msk [vmem:[%s1127_s1] sm:$0x1] %vm328_vm4, %v327_v51   ;;  %vm436_vm4 = vcmask 130104  }
  0xce   :  { %v333_v52 = vpop.permute.xlu0 %332   ;;  %v340_v53 = vpop.permute.xlu1 %339  }
  0xcf   :  { %546 = vst.msk [vmem:[%s1127_s1 + $0x1] sm:$0x1] %vm334_vm5, %v333_v52   ;;  %vm443_vm5 = vcmask 113704  }
  0xd0   :  { %548 = vst.msk [vmem:[%s1127_s1 + $0x2] sm:$0x1] %vm341_vm6, %v340_v53   ;;  %vm450_vm6 = vcmask 97304  }
  0xd2   :  { %v347_v54 = vpop.permute.xlu0 %346   ;;  %v354_v55 = vpop.permute.xlu1 %353  }
  0xd3   :  { %550 = vst.msk [vmem:[%s1127_s1 + $0x3] sm:$0x1] %vm348_vm7, %v347_v54   ;;  %vm457_vm7 = vcmask 80904  }
  0xd4   :  { %552 = vst.msk [vmem:[%s1127_s1 + $0x4] sm:$0x1] %vm355_vm8, %v354_v55  }
  0xd6   :  { %v361_v56 = vpop.permute.xlu0 %360   ;;  %v367_v57 = vpop.permute.xlu1 %366  }
  0xd7   :  { %363 = vst.msk [vmem:[%s1127_s1] sm:$0x1] %vm362_vm9, %v361_v56  }
  0xd8   :  { %555 = vst.msk [vmem:[%s1127_s1 + $0x1] sm:$0x1] %vm368_vm10, %v367_v57  }
  0xda   :  { %v374_v58 = vpop.permute.xlu0 %373   ;;  %v381_v59 = vpop.permute.xlu1 %380  }
  0xdb   :  { %557 = vst.msk [vmem:[%s1127_s1 + $0x2] sm:$0x1] %vm375_vm11, %v374_v58  }
  0xdc   :  { %559 = vst.msk [vmem:[%s1127_s1 + $0x3] sm:$0x1] %vm382_vm12, %v381_v59  }
  0xde   :  { %v388_v60 = vpop.permute.xlu0 %387   ;;  %v395_v61 = vpop.permute.xlu1 %394  }
  0xdf   :  { %561 = vst.msk [vmem:[%s1127_s1 + $0x4] sm:$0x1] %vm389_vm13, %v388_v60  }
  0xe0   :  { %397 = vst.msk [vmem:[%s1127_s1] sm:$0x1] %vm396_vm14, %v395_v61  }
  0xe2   :  { %v401_v62 = vpop.permute.xlu0 %400   ;;  %v408_v63 = vpop.permute.xlu1 %407  }
  0xe3   :  { %564 = vst.msk [vmem:[%s1127_s1 + $0x1] sm:$0x1] %vm402_vm15, %v401_v62  }
  0xe4   :  { %566 = vst.msk [vmem:[%s1127_s1 + $0x2] sm:$0x1] %vm409_vm0, %v408_v63  }
  0xe6   :  { %v415_v0 = vpop.permute.xlu0 %414   ;;  %v422_v1 = vpop.permute.xlu1 %421  }
  0xe7   :  { %568 = vst.msk [vmem:[%s1127_s1 + $0x3] sm:$0x1] %vm416_vm1, %v415_v0  }
  0xe8   :  { %570 = vst.msk [vmem:[%s1127_s1 + $0x4] sm:$0x1] %vm423_vm2, %v422_v1  }
  0xea   :  { %v429_v2 = vpop.permute.xlu0 %428   ;;  %v435_v3 = vpop.permute.xlu1 %434  }
  0xeb   :  { %431 = vst.msk [vmem:[%s1127_s1] sm:$0x1] %vm430_vm3, %v429_v2  }
  0xec   :  { %573 = vst.msk [vmem:[%s1127_s1 + $0x1] sm:$0x1] %vm436_vm4, %v435_v3  }
  0xee   :  { %v442_v4 = vpop.permute.xlu0 %441   ;;  %v449_v5 = vpop.permute.xlu1 %448  }
  0xef   :  { %575 = vst.msk [vmem:[%s1127_s1 + $0x2] sm:$0x1] %vm443_vm5, %v442_v4  }
  0xf0   :  { %577 = vst.msk [vmem:[%s1127_s1 + $0x3] sm:$0x1] %vm450_vm6, %v449_v5  }
  0xf2   :  { %v456_v6 = vpop.permute.xlu0 %455  }
  0xf3   :  { %579 = vst.msk [vmem:[%s1127_s1 + $0x4] sm:$0x1] %vm457_vm7, %v456_v6  }

</bundles_post_ra>
